<compile_context>
chip_gen: v6e
topology: v6e:2x2x1
jax: 0.10.0
libtpu: 0.0.40
codegen_flags: <defaults>
</compile_context>

<pallas_src>
import math

import jax
import jax.numpy as jnp
from jax import lax
from jax.experimental import pallas as pl
from jax.experimental.pallas import tpu as pltpu

# ----- small synthetic BERT config -----
VOCAB = 100       # vocab size
MAX_POS = 32      # max position embeddings
TYPE_VOCAB = 2    # token type vocab
B = 2             # batch
S = 8             # sequence length
H = 32            # hidden size
NH = 2            # attention heads
HD = H // NH      # head dim
I = 64            # FFN intermediate size
L = 2             # number of encoder layers
C = 3             # num_classes
G = B * NH        # flattened (batch, head) groups
LN_EPS = 1e-12    # BERT layernorm eps

# ----- packed weight-slab geometry (all lane offsets 128-aligned) -----
W_COLS = 512                       # columns of the bf16 weight slab
W_ROWS = L * H + H                 # L per-layer row blocks + pooler/classifier block
COL_QKV, COL_WO, COL_W1, COL_W2T = 0, 128, 256, 384
COL_WP, COL_WC = 0, 128
V_PER_LAYER = 8                    # bias/gamma/beta rows per layer in vector slab
V_ROWS = L * V_PER_LAYER + 4       # + ln_emb_g, ln_emb_b, pooler bias, classifier bias

# ----- packed embedding-slab geometry (8-sublane aligned row blocks) -----
OFF_WORD = 0
OFF_POS = ((VOCAB + 7) // 8) * 8                       # 104
OFF_TYPE = OFF_POS + MAX_POS                           # 136
EMB_ROWS = ((OFF_TYPE + TYPE_VOCAB + 7) // 8) * 8      # 144
ONEHOT_W = OFF_POS                                     # padded word-table height


def _layernorm(x, g, b):
    mu = jnp.mean(x, axis=-1, keepdims=True)
    var = jnp.mean((x - mu) ** 2, axis=-1, keepdims=True)
    return (x - mu) * lax.rsqrt(var + LN_EPS) * g + b


def _gelu(x):
    # TODO(synk): HF BERT default is exact erf GELU; tanh approximation keeps
    # the lowering on the EUP path (small numeric deviation).
    c = math.sqrt(2.0 / math.pi)
    return 0.5 * x * (1.0 + jnp.tanh(c * (x + 0.044715 * x * x * x)))


def bert_kernel(ids_ref, mask_ref, emb_ref, w_ref, v_ref, out_ref):
    # ids_ref : (B*S, 1) int32   token ids, batch-flattened
    # mask_ref: (B, S)   int32   attention mask (1 = attend)
    # emb_ref : (EMB_ROWS, H) f32   word/pos/type embedding slab
    # w_ref   : (L*H + H, 512) bf16 weight slab
    # v_ref   : (V_ROWS, 128)  f32  bias / gamma / beta slab
    # out_ref : (B, C) f32     logits
    f32, bf16 = jnp.float32, jnp.bfloat16

    def vrow(r, width):
        return v_ref[r:r + 1, 0:width]                 # (1, width) f32

    tail = L * V_PER_LAYER

    # ---- embeddings: one-hot matmul word gather + static pos/type rows ----
    ids = ids_ref[...]                                                  # (B*S, 1)
    col = lax.broadcasted_iota(jnp.int32, (B * S, ONEHOT_W), 1)
    onehot = (col == ids).astype(f32)                                   # (B*S, ONEHOT_W)
    we = jnp.dot(onehot, emb_ref[OFF_WORD:OFF_WORD + ONEHOT_W, :],
                 preferred_element_type=f32)                            # (B*S, H)
    pe = jnp.concatenate([emb_ref[OFF_POS:OFF_POS + S, :]] * B, axis=0)  # (B*S, H)
    te = emb_ref[OFF_TYPE:OFF_TYPE + 1, :]                              # token_type_ids = 0
    x = _layernorm(we + pe + te, vrow(tail + 0, H), vrow(tail + 1, H))  # (B*S, H)

    # ---- additive attention mask, hoisted, per (batch, head) group ----
    add_mask = (1.0 - mask_ref[...].astype(f32)) * -1e9                 # (B, S)
    maskg = jnp.stack([add_mask[b:b + 1, :]
                       for b in range(B) for _ in range(NH)], axis=0)   # (G, 1, S)

    for l in range(L):                                  # static layer loop
        rb = l * H
        vb = l * V_PER_LAYER
        wqkv = w_ref[rb:rb + H, COL_QKV:COL_QKV + 3 * H]    # (H, 3H) bf16
        wo = w_ref[rb:rb + H, COL_WO:COL_WO + H]            # (H, H)
        w1 = w_ref[rb:rb + H, COL_W1:COL_W1 + I]            # (H, I)
        w2t = w_ref[rb:rb + H, COL_W2T:COL_W2T + I]         # (H, I) = W2.T

        # fused QKV projection over all B*S rows (Q pre-scaled by 1/sqrt(HD));
        # kept f32 -- cast per-operand at the MXU below.
        qkv = jnp.dot(x.astype(bf16), wqkv,
                      preferred_element_type=f32) + vrow(vb + 0, 3 * H)  # (B*S, 3H) f32

        def heads(off):
            # gather head blocks into a (G, S, HD) batch for one fused einsum
            return jnp.stack(
                [qkv[b * S:(b + 1) * S, off + h * HD:off + (h + 1) * HD]
                 for b in range(B) for h in range(NH)], axis=0)

        qg = heads(0).astype(bf16)          # (G, S, HD)
        kg = heads(H).astype(bf16)
        vg = heads(2 * H).astype(bf16)

        # one batched scores matmul + one fused softmax over all B*NH tiles
        scores = jnp.einsum('gqd,gkd->gqk', qg, kg,
                            preferred_element_type=f32) + maskg          # (G, S, S)
        e = jnp.exp(scores - jnp.max(scores, axis=-1, keepdims=True))
        p = e * pl.reciprocal(jnp.sum(e, axis=-1, keepdims=True), approx=True)
        ctx = jnp.einsum('gqk,gkd->gqd', p.astype(bf16), vg,
                         preferred_element_type=f32)                     # (G, S, HD)

        # register-resident reassembly of per-head contexts (no VMEM scratch)
        attn_in = jnp.concatenate(
            [jnp.concatenate([ctx[b * NH + h] for h in range(NH)], axis=-1)
             for b in range(B)], axis=0)                                 # (B*S, H)
        attn = jnp.dot(attn_in.astype(bf16), wo,
                       preferred_element_type=f32) + vrow(vb + 1, H)
        x = _layernorm(x + attn, vrow(vb + 2, H), vrow(vb + 3, H))

        ff = _gelu(jnp.dot(x.astype(bf16), w1,
                           preferred_element_type=f32) + vrow(vb + 4, I))
        ff = lax.dot_general(ff.astype(bf16), w2t,
                             (((1,), (1,)), ((), ())),
                             preferred_element_type=f32) + vrow(vb + 5, H)
        x = _layernorm(x + ff, vrow(vb + 6, H), vrow(vb + 7, H))

    # ---- pooler + classifier on all B*S rows, slice CLS rows of the result ----
    wp = w_ref[L * H:(L + 1) * H, COL_WP:COL_WP + H]
    wc = w_ref[L * H:(L + 1) * H, COL_WC:COL_WC + H]      # zero-padded beyond C
    pooled = jnp.tanh(jnp.dot(x.astype(bf16), wp,
                              preferred_element_type=f32) + vrow(tail + 2, H))
    logits = jnp.dot(pooled.astype(bf16), wc,
                     preferred_element_type=f32) + vrow(tail + 3, H)     # (B*S, H)
    out_ref[...] = jnp.concatenate(
        [logits[b * S:b * S + 1, 0:C] for b in range(B)], axis=0)        # (B, C)


def init_params(key):
    std = 0.02
    ks = jax.random.split(key, 11)
    n = lambda k, shp: jax.random.normal(k, shp, jnp.float32) * std
    return {
        "word_emb": n(ks[0], (VOCAB, H)),
        "pos_emb": n(ks[1], (MAX_POS, H)),
        "type_emb": n(ks[2], (TYPE_VOCAB, H)),
        "ln_eg": jnp.ones((H,), jnp.float32), "ln_eb": jnp.zeros((H,), jnp.float32),
        "wq": n(ks[3], (L, H, H)), "bq": jnp.zeros((L, H), jnp.float32),
        "wk": n(ks[4], (L, H, H)), "bk": jnp.zeros((L, H), jnp.float32),
        "wv": n(ks[5], (L, H, H)), "bv": jnp.zeros((L, H), jnp.float32),
        "wo": n(ks[6], (L, H, H)), "bo": jnp.zeros((L, H), jnp.float32),
        "ln1g": jnp.ones((L, H), jnp.float32), "ln1b": jnp.zeros((L, H), jnp.float32),
        "w1": n(ks[7], (L, H, I)), "b1": jnp.zeros((L, I), jnp.float32),
        "w2": n(ks[8], (L, I, H)), "b2": jnp.zeros((L, H), jnp.float32),
        "ln2g": jnp.ones((L, H), jnp.float32), "ln2b": jnp.zeros((L, H), jnp.float32),
        "wp": n(ks[9], (H, H)), "bp": jnp.zeros((H,), jnp.float32),
        "wc": n(ks[10], (H, C)), "bc": jnp.zeros((C,), jnp.float32),
    }


def pack_params(p):
    """ONE-TIME packing (parameter-load time, NOT per forward call):
    bf16 weight slab + f32 vector slab + f32 embedding slab."""
    scale = 1.0 / math.sqrt(HD)
    w = jnp.zeros((W_ROWS, W_COLS), jnp.float32)
    v = jnp.zeros((V_ROWS, 128), jnp.float32)
    for l in range(L):
        rb, vb = l * H, l * V_PER_LAYER
        wqkv = jnp.concatenate([p["wq"][l] * scale, p["wk"][l], p["wv"][l]], axis=1)
        w = w.at[rb:rb + H, COL_QKV:COL_QKV + 3 * H].set(wqkv)
        w = w.at[rb:rb + H, COL_WO:COL_WO + H].set(p["wo"][l])
        w = w.at[rb:rb + H, COL_W1:COL_W1 + I].set(p["w1"][l])
        w = w.at[rb:rb + H, COL_W2T:COL_W2T + I].set(p["w2"][l].T)
        bqkv = jnp.concatenate([p["bq"][l] * scale, p["bk"][l], p["bv"][l]], axis=0)
        v = v.at[vb + 0, 0:3 * H].set(bqkv)
        v = v.at[vb + 1, 0:H].set(p["bo"][l])
        v = v.at[vb + 2, 0:H].set(p["ln1g"][l])
        v = v.at[vb + 3, 0:H].set(p["ln1b"][l])
        v = v.at[vb + 4, 0:I].set(p["b1"][l])
        v = v.at[vb + 5, 0:H].set(p["b2"][l])
        v = v.at[vb + 6, 0:H].set(p["ln2g"][l])
        v = v.at[vb + 7, 0:H].set(p["ln2b"][l])
    w = w.at[L * H:(L + 1) * H, COL_WP:COL_WP + H].set(p["wp"])
    w = w.at[L * H:(L + 1) * H, COL_WC:COL_WC + C].set(p["wc"])
    tail = L * V_PER_LAYER
    v = v.at[tail + 0, 0:H].set(p["ln_eg"])
    v = v.at[tail + 1, 0:H].set(p["ln_eb"])
    v = v.at[tail + 2, 0:H].set(p["bp"])
    v = v.at[tail + 3, 0:C].set(p["bc"])

    emb = jnp.zeros((EMB_ROWS, H), jnp.float32)
    emb = emb.at[OFF_WORD:OFF_WORD + VOCAB].set(p["word_emb"])
    emb = emb.at[OFF_POS:OFF_POS + MAX_POS].set(p["pos_emb"])
    emb = emb.at[OFF_TYPE:OFF_TYPE + TYPE_VOCAB].set(p["type_emb"])
    return w.astype(jnp.bfloat16), v, emb


@jax.jit
def bert_forward(w_slab, v_slab, emb_slab, input_ids, attention_mask):
    # only tiny per-call glue here; all parameter packing is done once upstream
    ids = input_ids.astype(jnp.int32).reshape(B * S, 1)
    mask = attention_mask.astype(jnp.int32)
    vmem = pl.BlockSpec(memory_space=pltpu.MemorySpace.VMEM)
    return pl.pallas_call(
        bert_kernel,
        out_shape=jax.ShapeDtypeStruct((B, C), jnp.float32),
        in_specs=[vmem, vmem, vmem, vmem, vmem],
        out_specs=vmem,
    )(ids, mask, emb_slab, w_slab, v_slab)


if __name__ == "__main__":
    key = jax.random.PRNGKey(0)
    pkey, ikey = jax.random.split(key)
    params = init_params(pkey)

    # parameter slabs built once, outside the per-call path
    w_slab, v_slab, emb_slab = pack_params(params)
    jax.block_until_ready((w_slab, v_slab, emb_slab))

    input_ids = jax.random.randint(ikey, (B, S), 0, VOCAB, dtype=jnp.int32)
    attention_mask = jnp.array(
        [[1] * S, [1] * (S - 3) + [0] * 3], dtype=jnp.int32)   # (B, S)

    logits = bert_forward(w_slab, v_slab, emb_slab, input_ids, attention_mask)
    jax.block_until_ready(logits)
    assert logits.shape == (B, C) and logits.dtype == jnp.float32
    print("KERNEL_OK")
</pallas_src>

<mosaic_0001>
module attributes {stable_mosaic.version = 11 : i64} {
  func.func @bert_kernel(%arg0: memref<16x1xi32, #tpu.memory_space<vmem>>, %arg1: memref<2x8xi32, #tpu.memory_space<vmem>>, %arg2: memref<144x32xf32, #tpu.memory_space<vmem>>, %arg3: memref<96x512xbf16, #tpu.memory_space<vmem>>, %arg4: memref<20x128xf32, #tpu.memory_space<vmem>>, %arg5: memref<2x3xf32, #tpu.memory_space<vmem>>) attributes {dimension_semantics = [], scalar_prefetch = 0 : i64, scratch_operands = 0 : i64, tpu.core_type = #tpu.core_type<tc>} {
    %c0 = arith.constant 0 : index
    %c0_0 = arith.constant 0 : index
    %0 = vector.load %arg0[%c0, %c0_0] : memref<16x1xi32, #tpu.memory_space<vmem>>, vector<16x1xi32>
    %1 = tpu.iota {dimensions = array<i32: 1>} : vector<16x104xi32>
    %2 = vector.broadcast %0 : vector<16x1xi32> to vector<16x104xi32>
    %3 = arith.cmpi eq, %1, %2 : vector<16x104xi32>
    %4 = arith.extui %3 : vector<16x104xi1> to vector<16x104xi32>
    %5 = arith.sitofp %4 : vector<16x104xi32> to vector<16x104xf32>
    %c0_1 = arith.constant 0 : index
    %c0_2 = arith.constant 0 : index
    %6 = vector.load %arg2[%c0_1, %c0_2] : memref<144x32xf32, #tpu.memory_space<vmem>>, vector<104x32xf32>
    %cst = arith.constant dense<0.000000e+00> : vector<16x32xf32>
    %7 = tpu.matmul %5, %6, %cst {dimension_numbers = #tpu.dot_dimension_numbers<[1], [0], [0], [1], [0, 0, 1, 1], [], []>} : vector<16x104xf32>, vector<104x32xf32>, vector<16x32xf32> -> vector<16x32xf32>
    %c104 = arith.constant 104 : index
    %c0_3 = arith.constant 0 : index
    %8 = vector.load %arg2[%c104, %c0_3] : memref<144x32xf32, #tpu.memory_space<vmem>>, vector<8x32xf32>
    %9 = tpu.concatenate %8, %8 in 0 : vector<8x32xf32>, vector<8x32xf32> -> vector<16x32xf32>
    %c136 = arith.constant 136 : index
    %c0_4 = arith.constant 0 : index
    %10 = vector.load %arg2[%c136, %c0_4] : memref<144x32xf32, #tpu.memory_space<vmem>>, vector<1x32xf32>
    %11 = arith.addf %7, %9 : vector<16x32xf32>
    %12 = vector.broadcast %10 : vector<1x32xf32> to vector<16x32xf32>
    %13 = arith.addf %11, %12 : vector<16x32xf32>
    %c16 = arith.constant 16 : index
    %c0_5 = arith.constant 0 : index
    %14 = vector.load %arg4[%c16, %c0_5] : memref<20x128xf32, #tpu.memory_space<vmem>>, vector<1x32xf32>
    %c17 = arith.constant 17 : index
    %c0_6 = arith.constant 0 : index
    %15 = vector.load %arg4[%c17, %c0_6] : memref<20x128xf32, #tpu.memory_space<vmem>>, vector<1x32xf32>
    %cst_7 = arith.constant dense<0.000000e+00> : vector<16xf32>
    %16 = vector.multi_reduction <add>, %13, %cst_7 [1] : vector<16x32xf32> to vector<16xf32>
    %17 = vector.shape_cast %16 : vector<16xf32> to vector<16x1xf32>
    %cst_8 = arith.constant 3.200000e+01 : f32
    %18 = vector.broadcast %cst_8 : f32 to vector<16x1xf32>
    %19 = arith.divf %17, %18 : vector<16x1xf32>
    %20 = vector.broadcast %19 : vector<16x1xf32> to vector<16x32xf32>
    %21 = arith.subf %13, %20 : vector<16x32xf32>
    %22 = arith.mulf %21, %21 : vector<16x32xf32>
    %cst_9 = arith.constant dense<0.000000e+00> : vector<16xf32>
    %23 = vector.multi_reduction <add>, %22, %cst_9 [1] : vector<16x32xf32> to vector<16xf32>
    %24 = vector.shape_cast %23 : vector<16xf32> to vector<16x1xf32>
    %cst_10 = arith.constant 3.200000e+01 : f32
    %25 = vector.broadcast %cst_10 : f32 to vector<16x1xf32>
    %26 = arith.divf %24, %25 : vector<16x1xf32>
    %27 = vector.broadcast %19 : vector<16x1xf32> to vector<16x32xf32>
    %28 = arith.subf %13, %27 : vector<16x32xf32>
    %cst_11 = arith.constant 9.99999996E-13 : f32
    %29 = vector.broadcast %cst_11 : f32 to vector<16x1xf32>
    %30 = arith.addf %26, %29 : vector<16x1xf32>
    %31 = math.rsqrt %30 : vector<16x1xf32>
    %32 = vector.broadcast %31 : vector<16x1xf32> to vector<16x32xf32>
    %33 = arith.mulf %28, %32 : vector<16x32xf32>
    %34 = vector.broadcast %14 : vector<1x32xf32> to vector<16x32xf32>
    %35 = arith.mulf %33, %34 : vector<16x32xf32>
    %36 = vector.broadcast %15 : vector<1x32xf32> to vector<16x32xf32>
    %37 = arith.addf %35, %36 : vector<16x32xf32>
    %c0_12 = arith.constant 0 : index
    %c0_13 = arith.constant 0 : index
    %38 = vector.load %arg1[%c0_12, %c0_13] : memref<2x8xi32, #tpu.memory_space<vmem>>, vector<2x8xi32>
    %39 = arith.sitofp %38 : vector<2x8xi32> to vector<2x8xf32>
    %cst_14 = arith.constant 1.000000e+00 : f32
    %40 = vector.broadcast %cst_14 : f32 to vector<2x8xf32>
    %41 = arith.subf %40, %39 : vector<2x8xf32>
    %cst_15 = arith.constant -1.000000e+09 : f32
    %42 = vector.broadcast %cst_15 : f32 to vector<2x8xf32>
    %43 = arith.mulf %41, %42 : vector<2x8xf32>
    %44 = vector.extract_strided_slice %43 {offsets = [0, 0], sizes = [1, 8], strides = [1, 1]} : vector<2x8xf32> to vector<1x8xf32>
    %45 = vector.extract_strided_slice %43 {offsets = [0, 0], sizes = [1, 8], strides = [1, 1]} : vector<2x8xf32> to vector<1x8xf32>
    %46 = vector.extract_strided_slice %43 {offsets = [1, 0], sizes = [1, 8], strides = [1, 1]} : vector<2x8xf32> to vector<1x8xf32>
    %47 = vector.extract_strided_slice %43 {offsets = [1, 0], sizes = [1, 8], strides = [1, 1]} : vector<2x8xf32> to vector<1x8xf32>
    %48 = vector.shape_cast %44 : vector<1x8xf32> to vector<1x1x8xf32>
    %49 = vector.shape_cast %45 : vector<1x8xf32> to vector<1x1x8xf32>
    %50 = vector.shape_cast %46 : vector<1x8xf32> to vector<1x1x8xf32>
    %51 = vector.shape_cast %47 : vector<1x8xf32> to vector<1x1x8xf32>
    %52 = tpu.concatenate %48, %49, %50, %51 in 0 : vector<1x1x8xf32>, vector<1x1x8xf32>, vector<1x1x8xf32>, vector<1x1x8xf32> -> vector<4x1x8xf32>
    %c0_16 = arith.constant 0 : index
    %c0_17 = arith.constant 0 : index
    %53 = vector.load %arg3[%c0_16, %c0_17] : memref<96x512xbf16, #tpu.memory_space<vmem>>, vector<32x96xbf16>
    %c0_18 = arith.constant 0 : index
    %c128 = arith.constant 128 : index
    %54 = vector.load %arg3[%c0_18, %c128] : memref<96x512xbf16, #tpu.memory_space<vmem>>, vector<32x32xbf16>
    %c0_19 = arith.constant 0 : index
    %c256 = arith.constant 256 : index
    %55 = vector.load %arg3[%c0_19, %c256] : memref<96x512xbf16, #tpu.memory_space<vmem>>, vector<32x64xbf16>
    %c0_20 = arith.constant 0 : index
    %c384 = arith.constant 384 : index
    %56 = vector.load %arg3[%c0_20, %c384] : memref<96x512xbf16, #tpu.memory_space<vmem>>, vector<32x64xbf16>
    %57 = arith.truncf %37 : vector<16x32xf32> to vector<16x32xbf16>
    %cst_21 = arith.constant dense<0.000000e+00> : vector<16x96xf32>
    %58 = tpu.matmul %57, %53, %cst_21 {dimension_numbers = #tpu.dot_dimension_numbers<[1], [0], [0], [1], [0, 0, 1, 1], [], []>} : vector<16x32xbf16>, vector<32x96xbf16>, vector<16x96xf32> -> vector<16x96xf32>
    %c0_22 = arith.constant 0 : index
    %c0_23 = arith.constant 0 : index
    %59 = vector.load %arg4[%c0_22, %c0_23] : memref<20x128xf32, #tpu.memory_space<vmem>>, vector<1x96xf32>
    %60 = vector.broadcast %59 : vector<1x96xf32> to vector<16x96xf32>
    %61 = arith.addf %58, %60 : vector<16x96xf32>
    %62 = vector.extract_strided_slice %61 {offsets = [0, 0], sizes = [8, 16], strides = [1, 1]} : vector<16x96xf32> to vector<8x16xf32>
    %63 = vector.extract_strided_slice %61 {offsets = [0, 16], sizes = [8, 16], strides = [1, 1]} : vector<16x96xf32> to vector<8x16xf32>
    %64 = vector.extract_strided_slice %61 {offsets = [8, 0], sizes = [8, 16], strides = [1, 1]} : vector<16x96xf32> to vector<8x16xf32>
    %65 = vector.extract_strided_slice %61 {offsets = [8, 16], sizes = [8, 16], strides = [1, 1]} : vector<16x96xf32> to vector<8x16xf32>
    %66 = vector.shape_cast %62 : vector<8x16xf32> to vector<1x8x16xf32>
    %67 = vector.shape_cast %63 : vector<8x16xf32> to vector<1x8x16xf32>
    %68 = vector.shape_cast %64 : vector<8x16xf32> to vector<1x8x16xf32>
    %69 = vector.shape_cast %65 : vector<8x16xf32> to vector<1x8x16xf32>
    %70 = tpu.concatenate %66, %67, %68, %69 in 0 : vector<1x8x16xf32>, vector<1x8x16xf32>, vector<1x8x16xf32>, vector<1x8x16xf32> -> vector<4x8x16xf32>
    %71 = arith.truncf %70 : vector<4x8x16xf32> to vector<4x8x16xbf16>
    %72 = vector.extract_strided_slice %61 {offsets = [0, 32], sizes = [8, 16], strides = [1, 1]} : vector<16x96xf32> to vector<8x16xf32>
    %73 = vector.extract_strided_slice %61 {offsets = [0, 48], sizes = [8, 16], strides = [1, 1]} : vector<16x96xf32> to vector<8x16xf32>
    %74 = vector.extract_strided_slice %61 {offsets = [8, 32], sizes = [8, 16], strides = [1, 1]} : vector<16x96xf32> to vector<8x16xf32>
    %75 = vector.extract_strided_slice %61 {offsets = [8, 48], sizes = [8, 16], strides = [1, 1]} : vector<16x96xf32> to vector<8x16xf32>
    %76 = vector.shape_cast %72 : vector<8x16xf32> to vector<1x8x16xf32>
    %77 = vector.shape_cast %73 : vector<8x16xf32> to vector<1x8x16xf32>
    %78 = vector.shape_cast %74 : vector<8x16xf32> to vector<1x8x16xf32>
    %79 = vector.shape_cast %75 : vector<8x16xf32> to vector<1x8x16xf32>
    %80 = tpu.concatenate %76, %77, %78, %79 in 0 : vector<1x8x16xf32>, vector<1x8x16xf32>, vector<1x8x16xf32>, vector<1x8x16xf32> -> vector<4x8x16xf32>
    %81 = arith.truncf %80 : vector<4x8x16xf32> to vector<4x8x16xbf16>
    %82 = vector.extract_strided_slice %61 {offsets = [0, 64], sizes = [8, 16], strides = [1, 1]} : vector<16x96xf32> to vector<8x16xf32>
    %83 = vector.extract_strided_slice %61 {offsets = [0, 80], sizes = [8, 16], strides = [1, 1]} : vector<16x96xf32> to vector<8x16xf32>
    %84 = vector.extract_strided_slice %61 {offsets = [8, 64], sizes = [8, 16], strides = [1, 1]} : vector<16x96xf32> to vector<8x16xf32>
    %85 = vector.extract_strided_slice %61 {offsets = [8, 80], sizes = [8, 16], strides = [1, 1]} : vector<16x96xf32> to vector<8x16xf32>
    %86 = vector.shape_cast %82 : vector<8x16xf32> to vector<1x8x16xf32>
    %87 = vector.shape_cast %83 : vector<8x16xf32> to vector<1x8x16xf32>
    %88 = vector.shape_cast %84 : vector<8x16xf32> to vector<1x8x16xf32>
    %89 = vector.shape_cast %85 : vector<8x16xf32> to vector<1x8x16xf32>
    %90 = tpu.concatenate %86, %87, %88, %89 in 0 : vector<1x8x16xf32>, vector<1x8x16xf32>, vector<1x8x16xf32>, vector<1x8x16xf32> -> vector<4x8x16xf32>
    %91 = arith.truncf %90 : vector<4x8x16xf32> to vector<4x8x16xbf16>
    "tpu.trace_start"() <{level = 10 : i32, message = "gqd,gkd->gqk"}> : () -> ()
    %cst_24 = arith.constant dense<0.000000e+00> : vector<4x8x8xf32>
    %92 = tpu.matmul %71, %81, %cst_24 {dimension_numbers = #tpu.dot_dimension_numbers<[2], [2], [1], [1], [0, 0, 0, 1, 1, 1], [0], [0]>} : vector<4x8x16xbf16>, vector<4x8x16xbf16>, vector<4x8x8xf32> -> vector<4x8x8xf32>
    "tpu.trace_stop"() : () -> ()
    %93 = vector.broadcast %52 : vector<4x1x8xf32> to vector<4x8x8xf32>
    %94 = arith.addf %92, %93 : vector<4x8x8xf32>
    %cst_25 = arith.constant dense<0xFF800000> : vector<4x8xf32>
    %95 = vector.multi_reduction <maximumf>, %94, %cst_25 [2] : vector<4x8x8xf32> to vector<4x8xf32>
    %96 = vector.shape_cast %95 : vector<4x8xf32> to vector<4x8x1xf32>
    %97 = vector.broadcast %96 : vector<4x8x1xf32> to vector<4x8x8xf32>
    %98 = arith.subf %94, %97 : vector<4x8x8xf32>
    %99 = math.exp %98 : vector<4x8x8xf32>
    %cst_26 = arith.constant dense<0.000000e+00> : vector<4x8xf32>
    %100 = vector.multi_reduction <add>, %99, %cst_26 [2] : vector<4x8x8xf32> to vector<4x8xf32>
    %101 = vector.shape_cast %100 : vector<4x8xf32> to vector<4x8x1xf32>
    %102 = tpu.reciprocal %101 {approx = true} : vector<4x8x1xf32> -> vector<4x8x1xf32>
    %103 = vector.broadcast %102 : vector<4x8x1xf32> to vector<4x8x8xf32>
    %104 = arith.mulf %99, %103 : vector<4x8x8xf32>
    %105 = arith.truncf %104 : vector<4x8x8xf32> to vector<4x8x8xbf16>
    "tpu.trace_start"() <{level = 10 : i32, message = "gqk,gkd->gqd"}> : () -> ()
    %cst_27 = arith.constant dense<0.000000e+00> : vector<4x8x16xf32>
    %106 = tpu.matmul %105, %91, %cst_27 {dimension_numbers = #tpu.dot_dimension_numbers<[2], [1], [1], [2], [0, 0, 0, 1, 1, 2], [0], [0]>} : vector<4x8x8xbf16>, vector<4x8x16xbf16>, vector<4x8x16xf32> -> vector<4x8x16xf32>
    "tpu.trace_stop"() : () -> ()
    %107 = vector.extract_strided_slice %106 {offsets = [0, 0, 0], sizes = [1, 8, 16], strides = [1, 1, 1]} : vector<4x8x16xf32> to vector<1x8x16xf32>
    %108 = vector.shape_cast %107 : vector<1x8x16xf32> to vector<8x16xf32>
    %109 = vector.extract_strided_slice %106 {offsets = [1, 0, 0], sizes = [1, 8, 16], strides = [1, 1, 1]} : vector<4x8x16xf32> to vector<1x8x16xf32>
    %110 = vector.shape_cast %109 : vector<1x8x16xf32> to vector<8x16xf32>
    %111 = tpu.concatenate %108, %110 in 1 : vector<8x16xf32>, vector<8x16xf32> -> vector<8x32xf32>
    %112 = vector.extract_strided_slice %106 {offsets = [2, 0, 0], sizes = [1, 8, 16], strides = [1, 1, 1]} : vector<4x8x16xf32> to vector<1x8x16xf32>
    %113 = vector.shape_cast %112 : vector<1x8x16xf32> to vector<8x16xf32>
    %114 = vector.extract_strided_slice %106 {offsets = [3, 0, 0], sizes = [1, 8, 16], strides = [1, 1, 1]} : vector<4x8x16xf32> to vector<1x8x16xf32>
    %115 = vector.shape_cast %114 : vector<1x8x16xf32> to vector<8x16xf32>
    %116 = tpu.concatenate %113, %115 in 1 : vector<8x16xf32>, vector<8x16xf32> -> vector<8x32xf32>
    %117 = tpu.concatenate %111, %116 in 0 : vector<8x32xf32>, vector<8x32xf32> -> vector<16x32xf32>
    %118 = arith.truncf %117 : vector<16x32xf32> to vector<16x32xbf16>
    %cst_28 = arith.constant dense<0.000000e+00> : vector<16x32xf32>
    %119 = tpu.matmul %118, %54, %cst_28 {dimension_numbers = #tpu.dot_dimension_numbers<[1], [0], [0], [1], [0, 0, 1, 1], [], []>} : vector<16x32xbf16>, vector<32x32xbf16>, vector<16x32xf32> -> vector<16x32xf32>
    %c1 = arith.constant 1 : index
    %c0_29 = arith.constant 0 : index
    %120 = vector.load %arg4[%c1, %c0_29] : memref<20x128xf32, #tpu.memory_space<vmem>>, vector<1x32xf32>
    %121 = vector.broadcast %120 : vector<1x32xf32> to vector<16x32xf32>
    %122 = arith.addf %119, %121 : vector<16x32xf32>
    %123 = arith.addf %37, %122 : vector<16x32xf32>
    %c2 = arith.constant 2 : index
    %c0_30 = arith.constant 0 : index
    %124 = vector.load %arg4[%c2, %c0_30] : memref<20x128xf32, #tpu.memory_space<vmem>>, vector<1x32xf32>
    %c3 = arith.constant 3 : index
    %c0_31 = arith.constant 0 : index
    %125 = vector.load %arg4[%c3, %c0_31] : memref<20x128xf32, #tpu.memory_space<vmem>>, vector<1x32xf32>
    %cst_32 = arith.constant dense<0.000000e+00> : vector<16xf32>
    %126 = vector.multi_reduction <add>, %123, %cst_32 [1] : vector<16x32xf32> to vector<16xf32>
    %127 = vector.shape_cast %126 : vector<16xf32> to vector<16x1xf32>
    %cst_33 = arith.constant 3.200000e+01 : f32
    %128 = vector.broadcast %cst_33 : f32 to vector<16x1xf32>
    %129 = arith.divf %127, %128 : vector<16x1xf32>
    %130 = vector.broadcast %129 : vector<16x1xf32> to vector<16x32xf32>
    %131 = arith.subf %123, %130 : vector<16x32xf32>
    %132 = arith.mulf %131, %131 : vector<16x32xf32>
    %cst_34 = arith.constant dense<0.000000e+00> : vector<16xf32>
    %133 = vector.multi_reduction <add>, %132, %cst_34 [1] : vector<16x32xf32> to vector<16xf32>
    %134 = vector.shape_cast %133 : vector<16xf32> to vector<16x1xf32>
    %cst_35 = arith.constant 3.200000e+01 : f32
    %135 = vector.broadcast %cst_35 : f32 to vector<16x1xf32>
    %136 = arith.divf %134, %135 : vector<16x1xf32>
    %137 = vector.broadcast %129 : vector<16x1xf32> to vector<16x32xf32>
    %138 = arith.subf %123, %137 : vector<16x32xf32>
    %cst_36 = arith.constant 9.99999996E-13 : f32
    %139 = vector.broadcast %cst_36 : f32 to vector<16x1xf32>
    %140 = arith.addf %136, %139 : vector<16x1xf32>
    %141 = math.rsqrt %140 : vector<16x1xf32>
    %142 = vector.broadcast %141 : vector<16x1xf32> to vector<16x32xf32>
    %143 = arith.mulf %138, %142 : vector<16x32xf32>
    %144 = vector.broadcast %124 : vector<1x32xf32> to vector<16x32xf32>
    %145 = arith.mulf %143, %144 : vector<16x32xf32>
    %146 = vector.broadcast %125 : vector<1x32xf32> to vector<16x32xf32>
    %147 = arith.addf %145, %146 : vector<16x32xf32>
    %148 = arith.truncf %147 : vector<16x32xf32> to vector<16x32xbf16>
    %cst_37 = arith.constant dense<0.000000e+00> : vector<16x64xf32>
    %149 = tpu.matmul %148, %55, %cst_37 {dimension_numbers = #tpu.dot_dimension_numbers<[1], [0], [0], [1], [0, 0, 1, 1], [], []>} : vector<16x32xbf16>, vector<32x64xbf16>, vector<16x64xf32> -> vector<16x64xf32>
    %c4 = arith.constant 4 : index
    %c0_38 = arith.constant 0 : index
    %150 = vector.load %arg4[%c4, %c0_38] : memref<20x128xf32, #tpu.memory_space<vmem>>, vector<1x64xf32>
    %151 = vector.broadcast %150 : vector<1x64xf32> to vector<16x64xf32>
    %152 = arith.addf %149, %151 : vector<16x64xf32>
    %cst_39 = arith.constant 5.000000e-01 : f32
    %153 = vector.broadcast %cst_39 : f32 to vector<16x64xf32>
    %154 = arith.mulf %153, %152 : vector<16x64xf32>
    %cst_40 = arith.constant 4.471500e-02 : f32
    %155 = vector.broadcast %cst_40 : f32 to vector<16x64xf32>
    %156 = arith.mulf %155, %152 : vector<16x64xf32>
    %157 = arith.mulf %156, %152 : vector<16x64xf32>
    %158 = arith.mulf %157, %152 : vector<16x64xf32>
    %159 = arith.addf %152, %158 : vector<16x64xf32>
    %cst_41 = arith.constant 0.797884583 : f32
    %160 = vector.broadcast %cst_41 : f32 to vector<16x64xf32>
    %161 = arith.mulf %160, %159 : vector<16x64xf32>
    %162 = math.tanh %161 : vector<16x64xf32>
    %cst_42 = arith.constant 1.000000e+00 : f32
    %163 = vector.broadcast %cst_42 : f32 to vector<16x64xf32>
    %164 = arith.addf %163, %162 : vector<16x64xf32>
    %165 = arith.mulf %154, %164 : vector<16x64xf32>
    %166 = arith.truncf %165 : vector<16x64xf32> to vector<16x64xbf16>
    %cst_43 = arith.constant dense<0.000000e+00> : vector<16x32xf32>
    %167 = tpu.matmul %166, %56, %cst_43 {dimension_numbers = #tpu.dot_dimension_numbers<[1], [1], [0], [0], [0, 0, 1, 0], [], []>} : vector<16x64xbf16>, vector<32x64xbf16>, vector<16x32xf32> -> vector<16x32xf32>
    %c5 = arith.constant 5 : index
    %c0_44 = arith.constant 0 : index
    %168 = vector.load %arg4[%c5, %c0_44] : memref<20x128xf32, #tpu.memory_space<vmem>>, vector<1x32xf32>
    %169 = vector.broadcast %168 : vector<1x32xf32> to vector<16x32xf32>
    %170 = arith.addf %167, %169 : vector<16x32xf32>
    %171 = arith.addf %147, %170 : vector<16x32xf32>
    %c6 = arith.constant 6 : index
    %c0_45 = arith.constant 0 : index
    %172 = vector.load %arg4[%c6, %c0_45] : memref<20x128xf32, #tpu.memory_space<vmem>>, vector<1x32xf32>
    %c7 = arith.constant 7 : index
    %c0_46 = arith.constant 0 : index
    %173 = vector.load %arg4[%c7, %c0_46] : memref<20x128xf32, #tpu.memory_space<vmem>>, vector<1x32xf32>
    %cst_47 = arith.constant dense<0.000000e+00> : vector<16xf32>
    %174 = vector.multi_reduction <add>, %171, %cst_47 [1] : vector<16x32xf32> to vector<16xf32>
    %175 = vector.shape_cast %174 : vector<16xf32> to vector<16x1xf32>
    %cst_48 = arith.constant 3.200000e+01 : f32
    %176 = vector.broadcast %cst_48 : f32 to vector<16x1xf32>
    %177 = arith.divf %175, %176 : vector<16x1xf32>
    %178 = vector.broadcast %177 : vector<16x1xf32> to vector<16x32xf32>
    %179 = arith.subf %171, %178 : vector<16x32xf32>
    %180 = arith.mulf %179, %179 : vector<16x32xf32>
    %cst_49 = arith.constant dense<0.000000e+00> : vector<16xf32>
    %181 = vector.multi_reduction <add>, %180, %cst_49 [1] : vector<16x32xf32> to vector<16xf32>
    %182 = vector.shape_cast %181 : vector<16xf32> to vector<16x1xf32>
    %cst_50 = arith.constant 3.200000e+01 : f32
    %183 = vector.broadcast %cst_50 : f32 to vector<16x1xf32>
    %184 = arith.divf %182, %183 : vector<16x1xf32>
    %185 = vector.broadcast %177 : vector<16x1xf32> to vector<16x32xf32>
    %186 = arith.subf %171, %185 : vector<16x32xf32>
    %cst_51 = arith.constant 9.99999996E-13 : f32
    %187 = vector.broadcast %cst_51 : f32 to vector<16x1xf32>
    %188 = arith.addf %184, %187 : vector<16x1xf32>
    %189 = math.rsqrt %188 : vector<16x1xf32>
    %190 = vector.broadcast %189 : vector<16x1xf32> to vector<16x32xf32>
    %191 = arith.mulf %186, %190 : vector<16x32xf32>
    %192 = vector.broadcast %172 : vector<1x32xf32> to vector<16x32xf32>
    %193 = arith.mulf %191, %192 : vector<16x32xf32>
    %194 = vector.broadcast %173 : vector<1x32xf32> to vector<16x32xf32>
    %195 = arith.addf %193, %194 : vector<16x32xf32>
    %c32 = arith.constant 32 : index
    %c0_52 = arith.constant 0 : index
    %196 = vector.load %arg3[%c32, %c0_52] : memref<96x512xbf16, #tpu.memory_space<vmem>>, vector<32x96xbf16>
    %c32_53 = arith.constant 32 : index
    %c128_54 = arith.constant 128 : index
    %197 = vector.load %arg3[%c32_53, %c128_54] : memref<96x512xbf16, #tpu.memory_space<vmem>>, vector<32x32xbf16>
    %c32_55 = arith.constant 32 : index
    %c256_56 = arith.constant 256 : index
    %198 = vector.load %arg3[%c32_55, %c256_56] : memref<96x512xbf16, #tpu.memory_space<vmem>>, vector<32x64xbf16>
    %c32_57 = arith.constant 32 : index
    %c384_58 = arith.constant 384 : index
    %199 = vector.load %arg3[%c32_57, %c384_58] : memref<96x512xbf16, #tpu.memory_space<vmem>>, vector<32x64xbf16>
    %200 = arith.truncf %195 : vector<16x32xf32> to vector<16x32xbf16>
    %cst_59 = arith.constant dense<0.000000e+00> : vector<16x96xf32>
    %201 = tpu.matmul %200, %196, %cst_59 {dimension_numbers = #tpu.dot_dimension_numbers<[1], [0], [0], [1], [0, 0, 1, 1], [], []>} : vector<16x32xbf16>, vector<32x96xbf16>, vector<16x96xf32> -> vector<16x96xf32>
    %c8 = arith.constant 8 : index
    %c0_60 = arith.constant 0 : index
    %202 = vector.load %arg4[%c8, %c0_60] : memref<20x128xf32, #tpu.memory_space<vmem>>, vector<1x96xf32>
    %203 = vector.broadcast %202 : vector<1x96xf32> to vector<16x96xf32>
    %204 = arith.addf %201, %203 : vector<16x96xf32>
    %205 = vector.extract_strided_slice %204 {offsets = [0, 0], sizes = [8, 16], strides = [1, 1]} : vector<16x96xf32> to vector<8x16xf32>
    %206 = vector.extract_strided_slice %204 {offsets = [0, 16], sizes = [8, 16], strides = [1, 1]} : vector<16x96xf32> to vector<8x16xf32>
    %207 = vector.extract_strided_slice %204 {offsets = [8, 0], sizes = [8, 16], strides = [1, 1]} : vector<16x96xf32> to vector<8x16xf32>
    %208 = vector.extract_strided_slice %204 {offsets = [8, 16], sizes = [8, 16], strides = [1, 1]} : vector<16x96xf32> to vector<8x16xf32>
    %209 = vector.shape_cast %205 : vector<8x16xf32> to vector<1x8x16xf32>
    %210 = vector.shape_cast %206 : vector<8x16xf32> to vector<1x8x16xf32>
    %211 = vector.shape_cast %207 : vector<8x16xf32> to vector<1x8x16xf32>
    %212 = vector.shape_cast %208 : vector<8x16xf32> to vector<1x8x16xf32>
    %213 = tpu.concatenate %209, %210, %211, %212 in 0 : vector<1x8x16xf32>, vector<1x8x16xf32>, vector<1x8x16xf32>, vector<1x8x16xf32> -> vector<4x8x16xf32>
    %214 = arith.truncf %213 : vector<4x8x16xf32> to vector<4x8x16xbf16>
    %215 = vector.extract_strided_slice %204 {offsets = [0, 32], sizes = [8, 16], strides = [1, 1]} : vector<16x96xf32> to vector<8x16xf32>
    %216 = vector.extract_strided_slice %204 {offsets = [0, 48], sizes = [8, 16], strides = [1, 1]} : vector<16x96xf32> to vector<8x16xf32>
    %217 = vector.extract_strided_slice %204 {offsets = [8, 32], sizes = [8, 16], strides = [1, 1]} : vector<16x96xf32> to vector<8x16xf32>
    %218 = vector.extract_strided_slice %204 {offsets = [8, 48], sizes = [8, 16], strides = [1, 1]} : vector<16x96xf32> to vector<8x16xf32>
    %219 = vector.shape_cast %215 : vector<8x16xf32> to vector<1x8x16xf32>
    %220 = vector.shape_cast %216 : vector<8x16xf32> to vector<1x8x16xf32>
    %221 = vector.shape_cast %217 : vector<8x16xf32> to vector<1x8x16xf32>
    %222 = vector.shape_cast %218 : vector<8x16xf32> to vector<1x8x16xf32>
    %223 = tpu.concatenate %219, %220, %221, %222 in 0 : vector<1x8x16xf32>, vector<1x8x16xf32>, vector<1x8x16xf32>, vector<1x8x16xf32> -> vector<4x8x16xf32>
    %224 = arith.truncf %223 : vector<4x8x16xf32> to vector<4x8x16xbf16>
    %225 = vector.extract_strided_slice %204 {offsets = [0, 64], sizes = [8, 16], strides = [1, 1]} : vector<16x96xf32> to vector<8x16xf32>
    %226 = vector.extract_strided_slice %204 {offsets = [0, 80], sizes = [8, 16], strides = [1, 1]} : vector<16x96xf32> to vector<8x16xf32>
    %227 = vector.extract_strided_slice %204 {offsets = [8, 64], sizes = [8, 16], strides = [1, 1]} : vector<16x96xf32> to vector<8x16xf32>
    %228 = vector.extract_strided_slice %204 {offsets = [8, 80], sizes = [8, 16], strides = [1, 1]} : vector<16x96xf32> to vector<8x16xf32>
    %229 = vector.shape_cast %225 : vector<8x16xf32> to vector<1x8x16xf32>
    %230 = vector.shape_cast %226 : vector<8x16xf32> to vector<1x8x16xf32>
    %231 = vector.shape_cast %227 : vector<8x16xf32> to vector<1x8x16xf32>
    %232 = vector.shape_cast %228 : vector<8x16xf32> to vector<1x8x16xf32>
    %233 = tpu.concatenate %229, %230, %231, %232 in 0 : vector<1x8x16xf32>, vector<1x8x16xf32>, vector<1x8x16xf32>, vector<1x8x16xf32> -> vector<4x8x16xf32>
    %234 = arith.truncf %233 : vector<4x8x16xf32> to vector<4x8x16xbf16>
    "tpu.trace_start"() <{level = 10 : i32, message = "gqd,gkd->gqk"}> : () -> ()
    %cst_61 = arith.constant dense<0.000000e+00> : vector<4x8x8xf32>
    %235 = tpu.matmul %214, %224, %cst_61 {dimension_numbers = #tpu.dot_dimension_numbers<[2], [2], [1], [1], [0, 0, 0, 1, 1, 1], [0], [0]>} : vector<4x8x16xbf16>, vector<4x8x16xbf16>, vector<4x8x8xf32> -> vector<4x8x8xf32>
    "tpu.trace_stop"() : () -> ()
    %236 = vector.broadcast %52 : vector<4x1x8xf32> to vector<4x8x8xf32>
    %237 = arith.addf %235, %236 : vector<4x8x8xf32>
    %cst_62 = arith.constant dense<0xFF800000> : vector<4x8xf32>
    %238 = vector.multi_reduction <maximumf>, %237, %cst_62 [2] : vector<4x8x8xf32> to vector<4x8xf32>
    %239 = vector.shape_cast %238 : vector<4x8xf32> to vector<4x8x1xf32>
    %240 = vector.broadcast %239 : vector<4x8x1xf32> to vector<4x8x8xf32>
    %241 = arith.subf %237, %240 : vector<4x8x8xf32>
    %242 = math.exp %241 : vector<4x8x8xf32>
    %cst_63 = arith.constant dense<0.000000e+00> : vector<4x8xf32>
    %243 = vector.multi_reduction <add>, %242, %cst_63 [2] : vector<4x8x8xf32> to vector<4x8xf32>
    %244 = vector.shape_cast %243 : vector<4x8xf32> to vector<4x8x1xf32>
    %245 = tpu.reciprocal %244 {approx = true} : vector<4x8x1xf32> -> vector<4x8x1xf32>
    %246 = vector.broadcast %245 : vector<4x8x1xf32> to vector<4x8x8xf32>
    %247 = arith.mulf %242, %246 : vector<4x8x8xf32>
    %248 = arith.truncf %247 : vector<4x8x8xf32> to vector<4x8x8xbf16>
    "tpu.trace_start"() <{level = 10 : i32, message = "gqk,gkd->gqd"}> : () -> ()
    %cst_64 = arith.constant dense<0.000000e+00> : vector<4x8x16xf32>
    %249 = tpu.matmul %248, %234, %cst_64 {dimension_numbers = #tpu.dot_dimension_numbers<[2], [1], [1], [2], [0, 0, 0, 1, 1, 2], [0], [0]>} : vector<4x8x8xbf16>, vector<4x8x16xbf16>, vector<4x8x16xf32> -> vector<4x8x16xf32>
    "tpu.trace_stop"() : () -> ()
    %250 = vector.extract_strided_slice %249 {offsets = [0, 0, 0], sizes = [1, 8, 16], strides = [1, 1, 1]} : vector<4x8x16xf32> to vector<1x8x16xf32>
    %251 = vector.shape_cast %250 : vector<1x8x16xf32> to vector<8x16xf32>
    %252 = vector.extract_strided_slice %249 {offsets = [1, 0, 0], sizes = [1, 8, 16], strides = [1, 1, 1]} : vector<4x8x16xf32> to vector<1x8x16xf32>
    %253 = vector.shape_cast %252 : vector<1x8x16xf32> to vector<8x16xf32>
    %254 = tpu.concatenate %251, %253 in 1 : vector<8x16xf32>, vector<8x16xf32> -> vector<8x32xf32>
    %255 = vector.extract_strided_slice %249 {offsets = [2, 0, 0], sizes = [1, 8, 16], strides = [1, 1, 1]} : vector<4x8x16xf32> to vector<1x8x16xf32>
    %256 = vector.shape_cast %255 : vector<1x8x16xf32> to vector<8x16xf32>
    %257 = vector.extract_strided_slice %249 {offsets = [3, 0, 0], sizes = [1, 8, 16], strides = [1, 1, 1]} : vector<4x8x16xf32> to vector<1x8x16xf32>
    %258 = vector.shape_cast %257 : vector<1x8x16xf32> to vector<8x16xf32>
    %259 = tpu.concatenate %256, %258 in 1 : vector<8x16xf32>, vector<8x16xf32> -> vector<8x32xf32>
    %260 = tpu.concatenate %254, %259 in 0 : vector<8x32xf32>, vector<8x32xf32> -> vector<16x32xf32>
    %261 = arith.truncf %260 : vector<16x32xf32> to vector<16x32xbf16>
    %cst_65 = arith.constant dense<0.000000e+00> : vector<16x32xf32>
    %262 = tpu.matmul %261, %197, %cst_65 {dimension_numbers = #tpu.dot_dimension_numbers<[1], [0], [0], [1], [0, 0, 1, 1], [], []>} : vector<16x32xbf16>, vector<32x32xbf16>, vector<16x32xf32> -> vector<16x32xf32>
    %c9 = arith.constant 9 : index
    %c0_66 = arith.constant 0 : index
    %263 = vector.load %arg4[%c9, %c0_66] : memref<20x128xf32, #tpu.memory_space<vmem>>, vector<1x32xf32>
    %264 = vector.broadcast %263 : vector<1x32xf32> to vector<16x32xf32>
    %265 = arith.addf %262, %264 : vector<16x32xf32>
    %266 = arith.addf %195, %265 : vector<16x32xf32>
    %c10 = arith.constant 10 : index
    %c0_67 = arith.constant 0 : index
    %267 = vector.load %arg4[%c10, %c0_67] : memref<20x128xf32, #tpu.memory_space<vmem>>, vector<1x32xf32>
    %c11 = arith.constant 11 : index
    %c0_68 = arith.constant 0 : index
    %268 = vector.load %arg4[%c11, %c0_68] : memref<20x128xf32, #tpu.memory_space<vmem>>, vector<1x32xf32>
    %cst_69 = arith.constant dense<0.000000e+00> : vector<16xf32>
    %269 = vector.multi_reduction <add>, %266, %cst_69 [1] : vector<16x32xf32> to vector<16xf32>
    %270 = vector.shape_cast %269 : vector<16xf32> to vector<16x1xf32>
    %cst_70 = arith.constant 3.200000e+01 : f32
    %271 = vector.broadcast %cst_70 : f32 to vector<16x1xf32>
    %272 = arith.divf %270, %271 : vector<16x1xf32>
    %273 = vector.broadcast %272 : vector<16x1xf32> to vector<16x32xf32>
    %274 = arith.subf %266, %273 : vector<16x32xf32>
    %275 = arith.mulf %274, %274 : vector<16x32xf32>
    %cst_71 = arith.constant dense<0.000000e+00> : vector<16xf32>
    %276 = vector.multi_reduction <add>, %275, %cst_71 [1] : vector<16x32xf32> to vector<16xf32>
    %277 = vector.shape_cast %276 : vector<16xf32> to vector<16x1xf32>
    %cst_72 = arith.constant 3.200000e+01 : f32
    %278 = vector.broadcast %cst_72 : f32 to vector<16x1xf32>
    %279 = arith.divf %277, %278 : vector<16x1xf32>
    %280 = vector.broadcast %272 : vector<16x1xf32> to vector<16x32xf32>
    %281 = arith.subf %266, %280 : vector<16x32xf32>
    %cst_73 = arith.constant 9.99999996E-13 : f32
    %282 = vector.broadcast %cst_73 : f32 to vector<16x1xf32>
    %283 = arith.addf %279, %282 : vector<16x1xf32>
    %284 = math.rsqrt %283 : vector<16x1xf32>
    %285 = vector.broadcast %284 : vector<16x1xf32> to vector<16x32xf32>
    %286 = arith.mulf %281, %285 : vector<16x32xf32>
    %287 = vector.broadcast %267 : vector<1x32xf32> to vector<16x32xf32>
    %288 = arith.mulf %286, %287 : vector<16x32xf32>
    %289 = vector.broadcast %268 : vector<1x32xf32> to vector<16x32xf32>
    %290 = arith.addf %288, %289 : vector<16x32xf32>
    %291 = arith.truncf %290 : vector<16x32xf32> to vector<16x32xbf16>
    %cst_74 = arith.constant dense<0.000000e+00> : vector<16x64xf32>
    %292 = tpu.matmul %291, %198, %cst_74 {dimension_numbers = #tpu.dot_dimension_numbers<[1], [0], [0], [1], [0, 0, 1, 1], [], []>} : vector<16x32xbf16>, vector<32x64xbf16>, vector<16x64xf32> -> vector<16x64xf32>
    %c12 = arith.constant 12 : index
    %c0_75 = arith.constant 0 : index
    %293 = vector.load %arg4[%c12, %c0_75] : memref<20x128xf32, #tpu.memory_space<vmem>>, vector<1x64xf32>
    %294 = vector.broadcast %293 : vector<1x64xf32> to vector<16x64xf32>
    %295 = arith.addf %292, %294 : vector<16x64xf32>
    %cst_76 = arith.constant 5.000000e-01 : f32
    %296 = vector.broadcast %cst_76 : f32 to vector<16x64xf32>
    %297 = arith.mulf %296, %295 : vector<16x64xf32>
    %cst_77 = arith.constant 4.471500e-02 : f32
    %298 = vector.broadcast %cst_77 : f32 to vector<16x64xf32>
    %299 = arith.mulf %298, %295 : vector<16x64xf32>
    %300 = arith.mulf %299, %295 : vector<16x64xf32>
    %301 = arith.mulf %300, %295 : vector<16x64xf32>
    %302 = arith.addf %295, %301 : vector<16x64xf32>
    %cst_78 = arith.constant 0.797884583 : f32
    %303 = vector.broadcast %cst_78 : f32 to vector<16x64xf32>
    %304 = arith.mulf %303, %302 : vector<16x64xf32>
    %305 = math.tanh %304 : vector<16x64xf32>
    %cst_79 = arith.constant 1.000000e+00 : f32
    %306 = vector.broadcast %cst_79 : f32 to vector<16x64xf32>
    %307 = arith.addf %306, %305 : vector<16x64xf32>
    %308 = arith.mulf %297, %307 : vector<16x64xf32>
    %309 = arith.truncf %308 : vector<16x64xf32> to vector<16x64xbf16>
    %cst_80 = arith.constant dense<0.000000e+00> : vector<16x32xf32>
    %310 = tpu.matmul %309, %199, %cst_80 {dimension_numbers = #tpu.dot_dimension_numbers<[1], [1], [0], [0], [0, 0, 1, 0], [], []>} : vector<16x64xbf16>, vector<32x64xbf16>, vector<16x32xf32> -> vector<16x32xf32>
    %c13 = arith.constant 13 : index
    %c0_81 = arith.constant 0 : index
    %311 = vector.load %arg4[%c13, %c0_81] : memref<20x128xf32, #tpu.memory_space<vmem>>, vector<1x32xf32>
    %312 = vector.broadcast %311 : vector<1x32xf32> to vector<16x32xf32>
    %313 = arith.addf %310, %312 : vector<16x32xf32>
    %314 = arith.addf %290, %313 : vector<16x32xf32>
    %c14 = arith.constant 14 : index
    %c0_82 = arith.constant 0 : index
    %315 = vector.load %arg4[%c14, %c0_82] : memref<20x128xf32, #tpu.memory_space<vmem>>, vector<1x32xf32>
    %c15 = arith.constant 15 : index
    %c0_83 = arith.constant 0 : index
    %316 = vector.load %arg4[%c15, %c0_83] : memref<20x128xf32, #tpu.memory_space<vmem>>, vector<1x32xf32>
    %cst_84 = arith.constant dense<0.000000e+00> : vector<16xf32>
    %317 = vector.multi_reduction <add>, %314, %cst_84 [1] : vector<16x32xf32> to vector<16xf32>
    %318 = vector.shape_cast %317 : vector<16xf32> to vector<16x1xf32>
    %cst_85 = arith.constant 3.200000e+01 : f32
    %319 = vector.broadcast %cst_85 : f32 to vector<16x1xf32>
    %320 = arith.divf %318, %319 : vector<16x1xf32>
    %321 = vector.broadcast %320 : vector<16x1xf32> to vector<16x32xf32>
    %322 = arith.subf %314, %321 : vector<16x32xf32>
    %323 = arith.mulf %322, %322 : vector<16x32xf32>
    %cst_86 = arith.constant dense<0.000000e+00> : vector<16xf32>
    %324 = vector.multi_reduction <add>, %323, %cst_86 [1] : vector<16x32xf32> to vector<16xf32>
    %325 = vector.shape_cast %324 : vector<16xf32> to vector<16x1xf32>
    %cst_87 = arith.constant 3.200000e+01 : f32
    %326 = vector.broadcast %cst_87 : f32 to vector<16x1xf32>
    %327 = arith.divf %325, %326 : vector<16x1xf32>
    %328 = vector.broadcast %320 : vector<16x1xf32> to vector<16x32xf32>
    %329 = arith.subf %314, %328 : vector<16x32xf32>
    %cst_88 = arith.constant 9.99999996E-13 : f32
    %330 = vector.broadcast %cst_88 : f32 to vector<16x1xf32>
    %331 = arith.addf %327, %330 : vector<16x1xf32>
    %332 = math.rsqrt %331 : vector<16x1xf32>
    %333 = vector.broadcast %332 : vector<16x1xf32> to vector<16x32xf32>
    %334 = arith.mulf %329, %333 : vector<16x32xf32>
    %335 = vector.broadcast %315 : vector<1x32xf32> to vector<16x32xf32>
    %336 = arith.mulf %334, %335 : vector<16x32xf32>
    %337 = vector.broadcast %316 : vector<1x32xf32> to vector<16x32xf32>
    %338 = arith.addf %336, %337 : vector<16x32xf32>
    %c64 = arith.constant 64 : index
    %c0_89 = arith.constant 0 : index
    %339 = vector.load %arg3[%c64, %c0_89] : memref<96x512xbf16, #tpu.memory_space<vmem>>, vector<32x32xbf16>
    %c64_90 = arith.constant 64 : index
    %c128_91 = arith.constant 128 : index
    %340 = vector.load %arg3[%c64_90, %c128_91] : memref<96x512xbf16, #tpu.memory_space<vmem>>, vector<32x32xbf16>
    %341 = arith.truncf %338 : vector<16x32xf32> to vector<16x32xbf16>
    %cst_92 = arith.constant dense<0.000000e+00> : vector<16x32xf32>
    %342 = tpu.matmul %341, %339, %cst_92 {dimension_numbers = #tpu.dot_dimension_numbers<[1], [0], [0], [1], [0, 0, 1, 1], [], []>} : vector<16x32xbf16>, vector<32x32xbf16>, vector<16x32xf32> -> vector<16x32xf32>
    %c18 = arith.constant 18 : index
    %c0_93 = arith.constant 0 : index
    %343 = vector.load %arg4[%c18, %c0_93] : memref<20x128xf32, #tpu.memory_space<vmem>>, vector<1x32xf32>
    %344 = vector.broadcast %343 : vector<1x32xf32> to vector<16x32xf32>
    %345 = arith.addf %342, %344 : vector<16x32xf32>
    %346 = math.tanh %345 : vector<16x32xf32>
    %347 = arith.truncf %346 : vector<16x32xf32> to vector<16x32xbf16>
    %cst_94 = arith.constant dense<0.000000e+00> : vector<16x32xf32>
    %348 = tpu.matmul %347, %340, %cst_94 {dimension_numbers = #tpu.dot_dimension_numbers<[1], [0], [0], [1], [0, 0, 1, 1], [], []>} : vector<16x32xbf16>, vector<32x32xbf16>, vector<16x32xf32> -> vector<16x32xf32>
    %c19 = arith.constant 19 : index
    %c0_95 = arith.constant 0 : index
    %349 = vector.load %arg4[%c19, %c0_95] : memref<20x128xf32, #tpu.memory_space<vmem>>, vector<1x32xf32>
    %350 = vector.broadcast %349 : vector<1x32xf32> to vector<16x32xf32>
    %351 = arith.addf %348, %350 : vector<16x32xf32>
    %352 = vector.extract_strided_slice %351 {offsets = [0, 0], sizes = [1, 3], strides = [1, 1]} : vector<16x32xf32> to vector<1x3xf32>
    %353 = vector.extract_strided_slice %351 {offsets = [8, 0], sizes = [1, 3], strides = [1, 1]} : vector<16x32xf32> to vector<1x3xf32>
    %354 = tpu.concatenate %352, %353 in 0 : vector<1x3xf32>, vector<1x3xf32> -> vector<2x3xf32>
    %c0_96 = arith.constant 0 : index
    %c0_97 = arith.constant 0 : index
    %355 = vector.load %arg5[%c0_96, %c0_97] : memref<2x3xf32, #tpu.memory_space<vmem>>, vector<2x3xf32>
    tpu.vector_store %arg5[%c0_96, %c0_97], %354 {strides = array<i32>} : memref<2x3xf32, #tpu.memory_space<vmem>>, vector<2x3xf32>,
    return
  }
}

</mosaic_0001>

<bundles_post_ra>
// kernel: bert_forward.1
= control target key start
LH: loop header
LB: loop body
LE: loop exit
PB: predicated region body
PF: predicated region fallthrough
CT: control target
= control target key end

     0   :  { %v2491_v2 = vmov 0   ;;  %v2492_v6 = vmov 0.0   ;;  %s2974_s0 = inlined_call_operand.vmem [shape: s32[16,1], index: 0, kind: input, shape index: {}]   ;;  %s2975_s1 = inlined_call_operand.vmem [shape: s32[2,8], index: 1, kind: input, shape index: {}]   ;;  %s2976_s2 = inlined_call_operand.vmem [shape: f32[144,32], index: 2, kind: input, shape index: {}]   ;;  %s2977_s3 = inlined_call_operand.vmem [shape: bf16[96,512], index: 3, kind: input, shape index: {}]   ;;  %s2978_s4 = inlined_call_operand.vmem [shape: f32[20,128], index: 4, kind: input, shape index: {}]   ;;  %s2979_s5 = inlined_call_operand.hbm [shape: f32[2,3], index: 5, kind: output, shape index: {}]  }
   0x1   :  { %v22_v0 = vld [vmem:[%s2974_s0] sm:$0xff]  ;;  %2374 = vset.pattern.permute.xlu0 %v2491_v2  ;;  %v49_v3 = vld [vmem:[%s2976_s2 + $0x58] sm:$0xff]  ;;  %v48_v4 = vld [vmem:[%s2976_s2 + $0x50] sm:$0xff]  ;;  %2190 = vmatprep.subr.bf16.mxu1 %v2492_v6 }
   0x2   :  { %v50_v1 = vld [vmem:[%s2976_s2 + $0x60] sm:$0xff]  ;;  %27 = vperm.xlu0 %2374, %v22_v0   ;;  %v23_v5 = vld [vmem:[%s2974_s0 + $0x8] sm:$0xff]  ;;  %v45_v9 = vld [vmem:[%s2976_s2 + $0x38] sm:$0xff] }
   0x3   :  { %2161 = vmatprep.subr.mxu0 %v50_v1  ;;  %v47_v7 = vld [vmem:[%s2976_s2 + $0x48] sm:$0xff]  ;;  %v46_v8 = vld [vmem:[%s2976_s2 + $0x40] sm:$0xff]  ;;  %v44_v10 = vld [vmem:[%s2976_s2 + $0x30] sm:$0xff] }
   0x4   :  { %2162 = vmatpush3.msra.mxu0 %v50_v1  ;;  %v43_v11 = vld [vmem:[%s2976_s2 + $0x28] sm:$0xff]  ;;  %v42_v12 = vld [vmem:[%s2976_s2 + $0x20] sm:$0xff]  ;;  %v41_v13 = vld [vmem:[%s2976_s2 + $0x18] sm:$0xff] }
   0x5   :  { %2163 = vmatprep.subr.mxu0 %v49_v3  ;;  %v40_v14 = vld [vmem:[%s2976_s2 + $0x10] sm:$0xff] }
   0x6   :  { %2164 = vmatpush3.msra.mxu0 %v49_v3  ;;  %30 = vperm.xlu0 %2374, %v23_v5  }
   0x7   :  { %2165 = vmatprep.subr.mxu0 %v48_v4 }
   0x8   :  { %2166 = vmatpush3.msra.mxu0 %v48_v4 }
   0x9   :  { %2167 = vmatprep.subr.mxu0 %v47_v7 }
   0xa   :  { %2168 = vmatpush3.msra.mxu0 %v47_v7 }
   0xb   :  { %2169 = vmatprep.subr.mxu0 %v46_v8 }
   0xc   :  { %2170 = vmatpush3.msra.mxu0 %v46_v8 }
   0xd   :  { %2171 = vmatprep.subr.mxu0 %v45_v9 }
   0xe   :  { %2172 = vmatpush3.msra.mxu0 %v45_v9 }
   0xf   :  { %2173 = vmatprep.subr.mxu0 %v44_v10 }
  0x10   :  { %2174 = vmatpush3.msra.mxu0 %v44_v10 }
  0x11   :  { %2175 = vmatprep.subr.mxu0 %v43_v11 }
  0x12   :  { %2176 = vmatpush3.msra.mxu0 %v43_v11 }
  0x13   :  { %2177 = vmatprep.subr.mxu0 %v42_v12 }
  0x14   :  { %2178 = vmatpush3.msra.mxu0 %v42_v12 }
  0x15   :  { %10 = vsyncpa [#allocation3], 0  ;;  %2179 = vmatprep.subr.mxu0 %v41_v13  ;;  %v39_v15 = vld [vmem:[%s2976_s2 + $0x8] sm:$0xff]  ;;  %v38_v16 = vld [vmem:[%s2976_s2] sm:$0xff]  ;;  %v24_v17 = vlaneseq  ;;  %vm53_vm0 = vcmask 850944   ;;  %vm143_vm3 = vcmask 261120  }
  0x16   :  { %2180 = vmatpush3.msra.mxu0 %v41_v13  ;;  %v51_v24 = vld [vmem:[%s2976_s2 + $0x68] sm:$0xff]  ;;  %v2385_v43 = vld [vmem:[%s2977_s3 + $0x20] ss:$16 sps:$4 sm:$0xff]   ;;  %vm2493_vm4 = vmmov 0   ;;  %s2494_s9 = smov 112   ;;  %s2495_s10 = smov 96  }
  0x17   :  { %2181 = vmatprep.subr.mxu0 %v40_v14  ;;  %v25_v18 = vand.u32 127, %v24_v17  ;;  %v2017_v28 = vld [vmem:[%s2976_s2 + $0x88] ss:$0 sm:$0xff]  ;;  %2194 = vmatprep.mubr.msk.bf16.mxu1 %vm2493_vm4, %v2492_v6  ;;  %v2386_v44 = vld [vmem:[%s2977_s3] ss:$16 sps:$4 sm:$0xff]   ;;  %vm291_vm5 = vcmask 130048  }
  0x18   :  { %2182 = vmatpush3.msra.mxu0 %v40_v14  ;;  %2191 = vmatpush3.bf16.msra.mxu1 %v2385_v43  ;;  %v2018_v53 = vld [vmem:[%s2978_s4 + $0x10] ss:$0 sm:$0xff]  ;;  %v2019_v57 = vld [vmem:[%s2978_s4 + $0x11] ss:$0 sm:$0xff]  ;;  %v2020_v62 = vld [vmem:[%s2978_s4] ss:$0 sm:$0xff] }
  0x19   :  { %2183 = vmatprep.subr.mxu0 %v39_v15  ;;  %2192 = vmatprep.subr.bf16.mxu1 %v2492_v6  ;;  %vm485_vm6 = vcmask 64512   ;;  %vm539_vm7 = vcmask 1043456   ;;  %s2497_s17 = smov 16   ;;  %vm937_vm8 = vcmask 523264   ;;  %s2498_s26 = smov [#allocation2]   ;;  %vm1995_vm9 = vcmask 1040384  }
  0x1a   :  { %2184 = vmatpush3.msra.mxu0 %v39_v15  ;;  %s2005_s27 = sshll.u32 %s2498_s26, 4  ;;  %vm1997_vm10 = vcmask 17408   ;;  %s2006_s27 = int_to_ptr.vmem [resolvable:$true] %s2005_s27 }
  0x1b   :  { %2185 = vmatprep.subr.mxu0 %v38_v16  ;;  %s2469_s28 = scalar_lea.vmem %s2006_s27, 32  ;;  %p2474_p1 = scmp.lt.s32.totalorder %s2006_s27, %s2006_s27 }
  0x1c   :  { %2186 = vmatpush3.msra.mxu0 %v38_v16  ;;  %2193 = vmatpush3.bf16.msra.mxu1 %v2386_v44  ;;  %p2470_p0 = scmp.ne.s32.totalorder %s2006_s27, %s2469_s28  ;;  %p2475_p2 = scmp.lt.s32.totalorder %s2469_s28, %s2469_s28 }
  0x1d   :  { %2216 = vmatprep.subr.bf16.mxu0 %v2492_v6  ;;  %2198 = vmatprep.subr.bf16.mxu1 %v2492_v6 }
  0x1e   :  { %p2476_p3 = por %p2475_p2, %p2474_p1 }
  0x20   :  { %p2477_p4 = pnand %p2476_p3, %p2470_p0 }
  0x7d   :  { %v28_v19 = vpop.permute.xlu0 %27 }
  0x7e   :  { %vm32_vm1 = vcmp.eq.s32.totalorder %v25_v18, %v28_v19 }
  0x7f   :  { %v2013_v20 = vsel %vm32_vm1, 1.0, %v2492_v6 }
  0x80   :  { %2187 = vmatprep.mubr.msk.f32.mxu0 %vm53_vm0, %v2013_v20 }
  0x81   :  { %v31_v21 = vpop.permute.xlu0 %30 }
  0x82   :  { %vm33_vm2 = vcmp.eq.s32.totalorder %v25_v18, %v31_v21 }
  0x83   :  { %v2014_v22 = vsel %vm33_vm2, 1.0, %v2492_v6 }
  0x84   :  { %2188 = vmatmul.mubr.msk.f32.vlgmr.msra.gmra.mxu0 %vm53_vm0, %v2014_v22 }
  0x85   :  { %2218 = vmatprep.mubr.msk.bf16.mxu0 %vm2493_vm4, %v2492_v6 }
 0x144   :  { %v2189_v23 = vpop.f32.mrf.mxu0 }
 0x145   :  { %v132_v26 = vadd.f32 %v2189_v23, %v51_v24 }
 0x146   :  { %v126_v25 = vpop.f32.mrf.mxu0 }
 0x147   :  { %v127_v27 = vadd.f32 %v126_v25, %v51_v24  ;;  %v140_v31 = vadd.f32 %v2017_v28, %v132_v26  ;;  %v183_v25 = vld [vmem:[%s2975_s1] sm:$0x3]  ;;  %s2496_s1 = smov 64  }
 0x148   :  { %v184_v26 = vcvt.s32.f32 %v183_v25 }
 0x149   :  { %v139_v29 = vadd.f32 %v2017_v28, %v127_v27  ;;  %v147_v32 = vsel %vm143_vm3, %v140_v31, 0.0  ;;  %v281_v27 = vshrl.u32 %v24_v17, 7 }
 0x14a   :  { %v185_v28 = vsub.f32 1.0, %v184_v26 }
 0x14b   :  { %v144_v30 = vsel %vm143_vm3, %v139_v29, 0.0 }
 0x14c   :  { %145 = vadd.xlane.f32.xlu1 %v144_v30  ;;  %v186_v30 = vmul.f32 -1e+09, %v185_v28 }
 0x150   :  { %148 = vadd.xlane.f32.xlu1 %v147_v32 }
 0x1d5   :  { %v146_v33 = vpop.xlane.xlu1 %145 }
 0x1d6   :  { %v151_v34 = vmul.f32 0.03125, %v146_v33 }
 0x1d8   :  { %v153_v35 = vsub.f32 %v139_v29, %v151_v34  ;;  %v282_v29 = vsub.s32 0, %v281_v27 }
 0x1d9   :  { %v149_v36 = vpop.xlane.xlu1 %148 }
 0x1da   :  { %v152_v37 = vmul.f32 0.03125, %v149_v36  ;;  %v155_v38 = vmul.f32 %v153_v35, %v153_v35  ;;  %v2665_v32 = vrot.slane %v186_v30, %v282_v29 }
 0x1dc   :  { %v154_v39 = vsub.f32 %v140_v31, %v152_v37  ;;  %v157_v40 = vsel %vm143_vm3, %v155_v38, 0.0  ;;  %v188_v31 = vrot.slane %v186_v30, 1 }
 0x1dd   :  { %158 = vadd.xlane.f32.xlu0 %v157_v40 }
 0x1de   :  { %v156_v41 = vmul.f32 %v154_v39, %v154_v39 }
 0x1e0   :  { %v160_v42 = vsel %vm143_vm3, %v156_v41, 0.0 }
 0x1e1   :  { %161 = vadd.xlane.f32.xlu1 %v160_v42 }
 0x266   :  { %v159_v45 = vpop.xlane.xlu0 %158 }
 0x267   :  { %v163_v46 = vmul.f32 0.03125, %v159_v45 }
 0x269   :  { %v165_v47 = vadd.f32 1e-12, %v163_v46 }
 0x26a   :  { %v162_v48 = vpop.xlane.xlu1 %161 }
 0x26b   :  { %2405 = vrsqrt.f32 %v165_v47  ;;  %v164_v49 = vmul.f32 0.03125, %v162_v48 }
 0x26d   :  { %v166_v50 = vadd.f32 1e-12, %v164_v49 }
 0x26f   :  { %2407 = vrsqrt.f32 %v166_v50 }
 0x278   :  { %v2406_v51 = vpop.eup %2405 }
 0x279   :  { %v169_v52 = vmul.f32 %v2406_v51, %v153_v35  ;;  %v2668_v35 = vrot.slane %v188_v31, %v282_v29 }
 0x27b   :  { %v175_v56 = vmul.f32 %v2018_v53, %v169_v52 }
 0x27c   :  { %v2408_v54 = vpop.eup %2407 }
 0x27d   :  { %v170_v55 = vmul.f32 %v2408_v54, %v154_v39  ;;  %v2607_v59 = vadd.f32 %v2019_v57, %v175_v56 }
 0x27f   :  { %v176_v58 = vmul.f32 %v2018_v53, %v170_v55 }
 0x281   :  { %v2609_v60 = vadd.f32 %v2019_v57, %v176_v58 }
 0x283   :  { %v206_v61 = vpack.c.bf16 %v2609_v60, %v2607_v59 }
 0x285   :  { %2195 = vmatmul.mubr.msk.bf16.vlgmr.msra.gmra.mxu1 %vm143_vm3, %v206_v61 }
 0x286   :  { %2200 = vmatprep.mubr.msk.bf16.mxu1 %vm2493_vm4, %v2492_v6 }
 0x345   :  { %v261_v63 = vpop.f32.mrf.mxu1 }
 0x346   :  { %v262_v0 = vadd.f32 %v2020_v62, %v261_v63 }
 0x347   :  { %v2196_v1 = vpop.f32.mrf.mxu1 }
 0x348   :  { %269 = vrot.lane.b32.xlu1 %v262_v0, %s2494_s9  ;;  %v2621_v5 = vpack.c.bf16 %v262_v0, %v262_v0 }
 0x349   :  { %v264_v2 = vpop.f32.mrf.mxu1 }
 0x34a   :  { %v265_v3 = vadd.f32 %v2020_v62, %v264_v2 }
 0x34b   :  { %v2197_v4 = vpop.f32.mrf.mxu1 }
 0x34c   :  { %273 = vrot.lane.b32.xlu1 %v265_v3, %s2494_s9  ;;  %v2629_v10 = vpack.c.bf16 %v265_v3, %v265_v3 }
 0x350   :  { %289 = vrot.lane.b32.xlu1 %v2621_v5, %s2495_s10 }
 0x3ba   :  { %v270_v7 = vpop.permute.xlu1 %269 }
 0x3bb   :  { %v2625_v8 = vpack.c.bf16 %v270_v7, %v270_v7 }
 0x3bd   :  { %339 = vrot.lane.b32.xlu1 %v2625_v8, %s2495_s10 }
 0x3be   :  { %v274_v9 = vpop.permute.xlu1 %273 }
 0x3bf   :  { %v2631_v11 = vpack.c.bf16 %v274_v9, %v274_v9 }
 0x3c1   :  { %437 = vrot.lane.b32.xlu0 %v2631_v11, %s2495_s10  ;;  %388 = vrot.lane.b32.xlu1 %v2629_v10, %s2495_s10 }
 0x3c2   :  { %v290_v12 = vpop.permute.xlu1 %289 }
 0x3c3   :  { %v296_v13 = vsel %vm291_vm5, %v290_v12, 0 }
 0x3c4   :  { %2199 = vmatpush3.bf16.xpose.msra.mxu1 %v296_v13 }
 0x3c5   :  { %2204 = vmatprep.subr.bf16.mxu1 %v2492_v6 }
 0x3cb   :  { %2201 = vmatmul.mubr.msk.bf16.vlgmr.msra.gmra.mxu1 %vm291_vm5, %v2621_v5 }
 0x3cc   :  { %2206 = vmatprep.mubr.msk.bf16.mxu1 %vm2493_vm4, %v2492_v6 }
 0x42f   :  { %v340_v14 = vpop.permute.xlu1 %339 }
 0x430   :  { %v345_v15 = vsel %vm291_vm5, %v340_v14, 0 }
 0x431   :  { %2205 = vmatpush3.bf16.xpose.msra.mxu1 %v345_v15 }
 0x432   :  { %2210 = vmatprep.subr.bf16.mxu1 %v2492_v6 }
 0x433   :  { %v438_v16 = vpop.permute.xlu0 %437  ;;  %v389_v19 = vpop.permute.xlu1 %388 }
 0x434   :  { %v443_v18 = vsel %vm291_vm5, %v438_v16, 0  ;;  %v394_v20 = vsel %vm291_vm5, %v389_v19, 0 }
 0x435   :  { %2217 = vmatpush3.bf16.xpose.msra.mxu0 %v443_v18 }
 0x436   :  { %2228 = vmatprep.subr.bf16.mxu0 %v2492_v6 }
 0x438   :  { %2207 = vmatmul.mubr.msk.bf16.vlgmr.msra.gmra.mxu1 %vm291_vm5, %v2625_v8 }
 0x439   :  { %2211 = vmatpush3.bf16.xpose.msra.mxu1 %v394_v20  ;;  %2212 = vmatprep.mubr.msk.bf16.mxu1 %vm2493_vm4, %v2492_v6 }
 0x43a   :  { %2222 = vmatprep.subr.bf16.mxu1 %v2492_v6 }
 0x43c   :  { %2219 = vmatmul.mubr.msk.bf16.vlgmr.msra.gmra.mxu0 %vm291_vm5, %v2631_v11 }
 0x43d   :  { %2230 = vmatprep.mubr.msk.bf16.mxu0 %vm2493_vm4, %v2492_v6 }
 0x440   :  { %2213 = vmatmul.mubr.msk.bf16.vlgmr.msra.gmra.mxu1 %vm291_vm5, %v2629_v10 }
 0x441   :  { %2224 = vmatprep.mubr.msk.bf16.mxu1 %vm2493_vm4, %v2492_v6 }
 0x48b   :  { %v332_v21 = vpop.f32.mrf.mxu1 }
 0x48c   :  { %v333_v37 = vadd.f32 %v332_v21, %v2665_v32 }
 0x48d   :  { %v2202_v22 = vpop.f32.mrf.mxu1 }
 0x48e   :  { %v486_v44 = vsel %vm485_vm6, %v333_v37, -inf }
 0x48f   :  { %v335_v23 = vpop.f32.mrf.mxu1 }
 0x491   :  { %v2203_v24 = vpop.f32.mrf.mxu1 }
 0x4f8   :  { %v381_v33 = vpop.f32.mrf.mxu1 }
 0x4f9   :  { %v382_v34 = vadd.f32 %v381_v33, %v2665_v32 }
 0x4fa   :  { %v2208_v36 = vpop.f32.mrf.mxu1 }
 0x4fb   :  { %v489_v38 = vsel %vm485_vm6, %v382_v34, -inf }
 0x4fc   :  { %v479_v39 = vpop.f32.mrf.mxu0  ;;  %490 = vmax.xlane.f32.xlu1 %v489_v38  ;;  %v384_v17 = vpop.f32.mrf.mxu1 }
 0x4fd   :  { %v480_v40 = vadd.f32 %v479_v39, %v2668_v35  ;;  %v2387_v39 = vld [vmem:[%s2977_s3 + $0x24] ss:$16 sps:$4 sm:$0xff]  }
 0x4fe   :  { %v2209_v41 = vpop.f32.mrf.mxu1  ;;  %v2220_v42 = vpop.f32.mrf.mxu0  ;;  %v2388_v17 = vld [vmem:[%s2977_s3 + $0x4] ss:$16 sps:$4 sm:$0xff]  }
 0x4ff   :  { %v495_v43 = vsel %vm485_vm6, %v480_v40, -inf }
 0x500   :  { %496 = vmax.xlane.f32.xlu0 %v495_v43  ;;  %v482_v45 = vpop.f32.mrf.mxu0  ;;  %487 = vmax.xlane.f32.xlu1 %v486_v44  ;;  %v430_v46 = vpop.f32.mrf.mxu1 }
 0x501   :  { %v431_v47 = vadd.f32 %v430_v46, %v2668_v35 }
 0x502   :  { %v2214_v48 = vpop.f32.mrf.mxu1  ;;  %v2221_v49 = vpop.f32.mrf.mxu0 }
 0x503   :  { %v492_v50 = vsel %vm485_vm6, %v431_v47, -inf }
 0x504   :  { %493 = vmax.xlane.f32.xlu1 %v492_v50  ;;  %v433_v51 = vpop.f32.mrf.mxu1 }
 0x506   :  { %v2215_v52 = vpop.f32.mrf.mxu1 }
 0x585   :  { %v491_v53 = vpop.xlane.xlu1 %490 }
 0x586   :  { %v499_v54 = vsub.f32 %v382_v34, %v491_v53 }
 0x588   :  { %v504_v55 = vmul.f32 1.442695, %v499_v54 }
 0x589   :  { %v497_v56 = vpop.xlane.xlu0 %496  ;;  %v488_v1 = vpop.xlane.xlu1 %487 }
 0x58a   :  { %2409 = vpow2.f32 %v504_v55  ;;  %v501_v57 = vsub.f32 %v480_v40, %v497_v56  ;;  %v498_v2 = vsub.f32 %v333_v37, %v488_v1  ;;  %v2032_v1 = vld [vmem:[%s2978_s4 + $0x1] ss:$0 sm:$0xff] }
 0x58c   :  { %v508_v58 = vmul.f32 1.442695, %v501_v57  ;;  %v502_v4 = vmul.f32 1.442695, %v498_v2 }
 0x58d   :  { %v494_v3 = vpop.xlane.xlu1 %493 }
 0x58e   :  { %2411 = vpow2.f32 %v508_v58  ;;  %v500_v7 = vsub.f32 %v431_v47, %v494_v3 }
 0x58f   :  { %2413 = vpow2.f32 %v502_v4 }
 0x590   :  { %v506_v9 = vmul.f32 1.442695, %v500_v7 }
 0x592   :  { %2415 = vpow2.f32 %v506_v9 }
 0x597   :  { %v2410_v61 = vpop.eup %2409 }
 0x598   :  { %v513_v62 = vsel %vm485_vm6, %v2410_v61, 0.0 }
 0x599   :  { %514 = vadd.xlane.f32.xlu1 %v513_v62 }
 0x59b   :  { %v2412_v63 = vpop.eup %2411 }
 0x59c   :  { %v519_v0 = vsel %vm485_vm6, %v2412_v63, 0.0  ;;  %v2414_v12 = vpop.eup %2413 }
 0x59d   :  { %520 = vadd.xlane.f32.xlu0 %v519_v0  ;;  %v510_v13 = vsel %vm485_vm6, %v2414_v12, 0.0 }
 0x59f   :  { %v2416_v14 = vpop.eup %2415 }
 0x5a0   :  { %v516_v15 = vsel %vm485_vm6, %v2416_v14, 0.0 }
 0x5aa   :  { %583 = vrot.lane.b32.xlu1 %v2625_v8, %s2496_s1 }
 0x5b3   :  { %679 = vrot.lane.b32.xlu0 %v2631_v11, %s2496_s1 }
 0x5ce   :  { %511 = vadd.xlane.f32.xlu1 %v510_v13 }
 0x5d2   :  { %517 = vadd.xlane.f32.xlu0 %v516_v15 }
 0x5df   :  { %534 = vrot.lane.b32.xlu1 %v2621_v5, %s2496_s1 }
 0x5e8   :  { %631 = vrot.lane.b32.xlu0 %v2629_v10, %s2496_s1 }
 0x622   :  { %v515_v8 = vpop.xlane.xlu1 %514 }
 0x623   :  { %2417 = vrcp.f32 %v515_v8 }
 0x626   :  { %v521_v11 = vpop.xlane.xlu0 %520  ;;  %v584_v16 = vpop.permute.xlu1 %583 }
 0x627   :  { %2419 = vrcp.f32 %v521_v11  ;;  %v589_v18 = vsel %vm539_vm7, %v584_v16, 0 }
 0x628   :  { %2229 = vmatpush3.bf16.msra.mxu0 %v589_v18 }
 0x629   :  { %2240 = vmatprep.subr.bf16.mxu0 %v2492_v6 }
 0x62a   :  { %v680_v21 = vpop.permute.xlu0 %679 }
 0x62b   :  { %v685_v5 = vsel %vm539_vm7, %v680_v21, 0 }
 0x630   :  { %v2418_v19 = vpop.eup %2417 }
 0x631   :  { %v527_v20 = vmul.f32 %v2418_v19, %v2410_v61 }
 0x633   :  { %v531_v22 = vpack.c.bf16 %v527_v20, %v527_v20 }
 0x634   :  { %v2420_v23 = vpop.eup %2419 }
 0x635   :  { %2231 = vmatmul.mubr.msk.bf16.vlgmr.msra.gmra.mxu0 %vm485_vm6, %v531_v22  ;;  %v529_v10 = vmul.f32 %v2420_v23, %v2412_v63 }
 0x636   :  { %2241 = vmatpush3.bf16.msra.mxu0 %v685_v5  ;;  %2242 = vmatprep.mubr.msk.bf16.mxu0 %vm2493_vm4, %v2492_v6 }
 0x637   :  { %2254 = vmatprep.subr.bf16.mxu0 %v2492_v6  ;;  %v533_v24 = vpack.c.bf16 %v529_v10, %v529_v10  ;;  %v2390_v10 = vld [vmem:[%s2977_s3 + $0x8] ss:$16 sps:$4 sm:$0xff]  }
 0x63d   :  { %2243 = vmatmul.mubr.msk.bf16.vlgmr.msra.gmra.mxu0 %vm485_vm6, %v533_v24 }
 0x63e   :  { %2258 = vmatprep.mubr.msk.bf16.mxu0 %vm2493_vm4, %v2492_v6 }
 0x657   :  { %v512_v25 = vpop.xlane.xlu1 %511 }
 0x658   :  { %2421 = vrcp.f32 %v512_v25 }
 0x65b   :  { %v518_v26 = vpop.xlane.xlu0 %517  ;;  %v535_v27 = vpop.permute.xlu1 %534 }
 0x65c   :  { %2423 = vrcp.f32 %v518_v26  ;;  %v541_v28 = vsel %vm539_vm7, %v535_v27, 0 }
 0x65d   :  { %2223 = vmatpush3.bf16.msra.mxu1 %v541_v28 }
 0x65e   :  { %2234 = vmatprep.subr.bf16.mxu1 %v2492_v6 }
 0x65f   :  { %v632_v31 = vpop.permute.xlu0 %631 }
 0x660   :  { %v637_v36 = vsel %vm539_vm7, %v632_v31, 0 }
 0x665   :  { %v2422_v29 = vpop.eup %2421 }
 0x666   :  { %v526_v30 = vmul.f32 %v2422_v29, %v2414_v12 }
 0x668   :  { %v530_v33 = vpack.c.bf16 %v526_v30, %v526_v30 }
 0x669   :  { %v2424_v34 = vpop.eup %2423 }
 0x66a   :  { %2225 = vmatmul.mubr.msk.bf16.vlgmr.msra.gmra.mxu1 %vm485_vm6, %v530_v33  ;;  %v528_v37 = vmul.f32 %v2424_v34, %v2416_v14  ;;  %v2036_v33 = vld [vmem:[%s2978_s4 + $0x2] ss:$0 sm:$0xff] }
 0x66b   :  { %2235 = vmatpush3.bf16.msra.mxu1 %v637_v36  ;;  %2236 = vmatprep.mubr.msk.bf16.mxu1 %vm2493_vm4, %v2492_v6 }
 0x66c   :  { %2246 = vmatprep.subr.bf16.mxu1 %v2492_v6  ;;  %v532_v38 = vpack.c.bf16 %v528_v37, %v528_v37 }
 0x672   :  { %2237 = vmatmul.mubr.msk.bf16.vlgmr.msra.gmra.mxu1 %vm485_vm6, %v532_v38  ;;  %v2037_v38 = vld [vmem:[%s2978_s4 + $0x3] ss:$0 sm:$0xff] }
 0x673   :  { %2250 = vmatprep.mubr.msk.bf16.mxu1 %vm2493_vm4, %v2492_v6  ;;  %2247 = vmatpush3.bf16.msra.mxu1 %v2387_v39 }
 0x674   :  { %2248 = vmatprep.subr.bf16.mxu1 %v2492_v6 }
 0x677   :  { %2249 = vmatpush3.bf16.msra.mxu1 %v2388_v17 }
 0x678   :  { %2262 = vmatprep.subr.bf16.mxu1 %v2492_v6 }
 0x6f5   :  { %v625_v40 = vpop.f32.mrf.mxu0 }
 0x6f7   :  { %v2232_v41 = vpop.f32.mrf.mxu0 }
 0x6f9   :  { %v628_v42 = vpop.f32.mrf.mxu0 }
 0x6fa   :  { %v2391_v42 = vld [vmem:[%s2977_s3 + $0x2c] ss:$16 sps:$4 sm:$0xff]  }
 0x6fb   :  { %v2233_v43 = vpop.f32.mrf.mxu0 }
 0x6fc   :  { %v945_v43 = vsel %vm937_vm8, %v2391_v42, 0  ;;  %v2046_v42 = vld [vmem:[%s2978_s4 + $0x6] ss:$0 sm:$0xff] }
 0x6fd   :  { %v721_v44 = vpop.f32.mrf.mxu0 }
 0x6fe   :  { %v2375_v45 = vpack.i.bf16 %v721_v44, %v625_v40  ;;  %v2392_v44 = vld [vmem:[%s2977_s3 + $0xc] ss:$16 sps:$4 sm:$0xff]  }
 0x6ff   :  { %v2244_v46 = vpop.f32.mrf.mxu0 }
 0x700   :  { %2376 = vrot.lane.b32.xlu1 %v2375_v45, %s2497_s17  ;;  %v942_v45 = vsel %vm937_vm8, %v2392_v44, 0  ;;  %v2038_v46 = vld [vmem:[%s2978_s4 + $0x4] ss:$0 sm:$0xff] }
 0x701   :  { %v724_v47 = vpop.f32.mrf.mxu0 }
 0x703   :  { %v2245_v48 = vpop.f32.mrf.mxu0 }
 0x72a   :  { %v577_v49 = vpop.f32.mrf.mxu1 }
 0x72c   :  { %v2226_v50 = vpop.f32.mrf.mxu1 }
 0x72e   :  { %v580_v51 = vpop.f32.mrf.mxu1 }
 0x730   :  { %v2227_v52 = vpop.f32.mrf.mxu1 }
 0x732   :  { %v673_v53 = vpop.f32.mrf.mxu1 }
 0x734   :  { %v2238_v54 = vpop.f32.mrf.mxu1 }
 0x736   :  { %v676_v55 = vpop.f32.mrf.mxu1 }
 0x738   :  { %v2239_v56 = vpop.f32.mrf.mxu1 }
 0x772   :  { %v2377_v57 = vpop.permute.xlu1 %2376 }
 0x773   :  { %v2379_v58 = vunpack.i.h.bf16 %v2377_v57  ;;  %v2378_v61 = vunpack.i.l.bf16 %v2377_v57 }
 0x775   :  { %v731_v62 = vsel %vm291_vm5, %v577_v49, %v2378_v61  ;;  %v736_v63 = vsel %vm291_vm5, %v673_v53, %v2379_v58 }
 0x776   :  { %v737_v0 = vpack.c.bf16 %v736_v63, %v731_v62 }
 0x778   :  { %2251 = vmatmul.mubr.msk.bf16.vlgmr.msra.gmra.mxu1 %vm143_vm3, %v737_v0 }
 0x779   :  { %2266 = vmatprep.mubr.msk.bf16.mxu1 %vm2493_vm4, %v2492_v6  ;;  %2263 = vmatpush3.bf16.xpose.msra.mxu1 %v945_v43 }
 0x77a   :  { %2264 = vmatprep.subr.bf16.mxu1 %v2492_v6 }
 0x781   :  { %2265 = vmatpush3.bf16.xpose.msra.mxu1 %v942_v45 }
 0x782   :  { %2284 = vmatprep.subr.bf16.mxu1 %v2492_v6 }
 0x838   :  { %v792_v2 = vpop.f32.mrf.mxu1 }
 0x839   :  { %v793_v3 = vadd.f32 %v2032_v1, %v792_v2 }
 0x83a   :  { %v2252_v4 = vpop.f32.mrf.mxu1 }
 0x83b   :  { %v799_v7 = vadd.f32 %v793_v3, %v2607_v59 }
 0x83c   :  { %v795_v9 = vpop.f32.mrf.mxu1 }
 0x83d   :  { %v796_v12 = vadd.f32 %v2032_v1, %v795_v9  ;;  %v803_v13 = vsel %vm143_vm3, %v799_v7, 0.0 }
 0x83e   :  { %804 = vadd.xlane.f32.xlu1 %v803_v13  ;;  %v2253_v14 = vpop.f32.mrf.mxu1 }
 0x83f   :  { %v800_v15 = vadd.f32 %v796_v12, %v2609_v60  ;;  %v2389_v60 = vld [vmem:[%s2977_s3 + $0x28] ss:$16 sps:$4 sm:$0xff]  }
 0x840   :  { %2255 = vmatpush3.bf16.msra.mxu0 %v2389_v60 }
 0x841   :  { %v806_v8 = vsel %vm143_vm3, %v800_v15, 0.0  ;;  %2256 = vmatprep.subr.bf16.mxu0 %v2492_v6 }
 0x842   :  { %807 = vadd.xlane.f32.xlu0 %v806_v8 }
 0x844   :  { %2257 = vmatpush3.bf16.msra.mxu0 %v2390_v10 }
 0x845   :  { %2270 = vmatprep.subr.bf16.mxu0 %v2492_v6 }
 0x8c7   :  { %v805_v11 = vpop.xlane.xlu1 %804 }
 0x8c8   :  { %v809_v16 = vmul.f32 0.03125, %v805_v11 }
 0x8ca   :  { %v811_v18 = vsub.f32 %v799_v7, %v809_v16 }
 0x8cb   :  { %v808_v19 = vpop.xlane.xlu0 %807 }
 0x8cc   :  { %v810_v20 = vmul.f32 0.03125, %v808_v19  ;;  %v813_v21 = vmul.f32 %v811_v18, %v811_v18 }
 0x8ce   :  { %v812_v22 = vsub.f32 %v800_v15, %v810_v20  ;;  %v815_v59 = vsel %vm143_vm3, %v813_v21, 0.0  ;;  %v2042_v15 = vld [vmem:[%s2978_s4 + $0x5] ss:$0 sm:$0xff] }
 0x8cf   :  { %816 = vadd.xlane.f32.xlu0 %v815_v59 }
 0x8d0   :  { %v814_v23 = vmul.f32 %v812_v22, %v812_v22 }
 0x8d2   :  { %v818_v5 = vsel %vm143_vm3, %v814_v23, 0.0 }
 0x8d3   :  { %819 = vadd.xlane.f32.xlu1 %v818_v5 }
 0x958   :  { %v817_v24 = vpop.xlane.xlu0 %816 }
 0x959   :  { %v821_v25 = vmul.f32 0.03125, %v817_v24 }
 0x95b   :  { %v823_v26 = vadd.f32 1e-12, %v821_v25 }
 0x95c   :  { %v820_v27 = vpop.xlane.xlu1 %819 }
 0x95d   :  { %2425 = vrsqrt.f32 %v823_v26  ;;  %v822_v28 = vmul.f32 0.03125, %v820_v27 }
 0x95f   :  { %v824_v29 = vadd.f32 1e-12, %v822_v28 }
 0x961   :  { %2427 = vrsqrt.f32 %v824_v29 }
 0x96a   :  { %v2426_v30 = vpop.eup %2425 }
 0x96b   :  { %v827_v31 = vmul.f32 %v2426_v30, %v811_v18 }
 0x96d   :  { %v833_v37 = vmul.f32 %v2036_v33, %v827_v31  ;;  %v2393_v31 = vld [vmem:[%s2977_s3 + $0x60] ss:$16 sps:$4 sm:$0xff]  }
 0x96e   :  { %v2428_v34 = vpop.eup %2427 }
 0x96f   :  { %v828_v36 = vmul.f32 %v2428_v34, %v812_v22  ;;  %v839_v17 = vadd.f32 %v2037_v38, %v833_v37 }
 0x971   :  { %v834_v39 = vmul.f32 %v2036_v33, %v828_v36  ;;  %v2394_v33 = vld [vmem:[%s2977_s3 + $0x40] ss:$16 sps:$4 sm:$0xff]  }
 0x973   :  { %v840_v40 = vadd.f32 %v2037_v38, %v834_v39 }
 0x975   :  { %v841_v41 = vpack.c.bf16 %v840_v40, %v839_v17 }
 0x977   :  { %2259 = vmatmul.mubr.msk.bf16.vlgmr.msra.gmra.mxu0 %vm143_vm3, %v841_v41 }
 0x978   :  { %2274 = vmatprep.mubr.msk.bf16.mxu0 %vm2493_vm4, %v2492_v6  ;;  %2271 = vmatpush3.bf16.msra.mxu0 %v2393_v31 }
 0x979   :  { %2272 = vmatprep.subr.bf16.mxu0 %v2492_v6 }
 0x97c   :  { %2273 = vmatpush3.bf16.msra.mxu0 %v2394_v33 }
 0x97d   :  { %2278 = vmatprep.subr.bf16.mxu0 %v2492_v6 }
 0xa37   :  { %v896_v47 = vpop.f32.mrf.mxu0 }
 0xa38   :  { %v897_v48 = vadd.f32 %v2038_v46, %v896_v47 }
 0xa39   :  { %v2260_v49 = vpop.f32.mrf.mxu0 }
 0xa3a   :  { %v905_v50 = vmul.f32 0.044715, %v897_v48  ;;  %v903_v4 = vmul.f32 0.5, %v897_v48 }
 0xa3b   :  { %v899_v51 = vpop.f32.mrf.mxu0 }
 0xa3c   :  { %v907_v52 = vmul.f32 %v905_v50, %v897_v48  ;;  %v900_v53 = vadd.f32 %v2038_v46, %v899_v51  ;;  %v2047_v46 = vld [vmem:[%s2978_s4 + $0x7] ss:$0 sm:$0xff]  ;;  %v2048_v51 = vld [vmem:[%s2978_s4 + $0x8] ss:$0 sm:$0xff] }
 0xa3d   :  { %v2261_v54 = vpop.f32.mrf.mxu0 }
 0xa3e   :  { %v909_v55 = vmul.f32 %v907_v52, %v897_v48  ;;  %v906_v56 = vmul.f32 0.044715, %v900_v53  ;;  %v904_v7 = vmul.f32 0.5, %v900_v53 }
 0xa40   :  { %v911_v57 = vadd.f32 %v909_v55, %v897_v48  ;;  %v908_v58 = vmul.f32 %v906_v56, %v900_v53 }
 0xa42   :  { %v913_v61 = vmul.f32 0.7978846, %v911_v57  ;;  %v910_v62 = vmul.f32 %v908_v58, %v900_v53 }
 0xa44   :  { %2429 = vtanh.f32 %v913_v61  ;;  %v912_v63 = vadd.f32 %v910_v62, %v900_v53 }
 0xa46   :  { %v914_v0 = vmul.f32 0.7978846, %v912_v63 }
 0xa48   :  { %2431 = vtanh.f32 %v914_v0 }
 0xa51   :  { %v2430_v1 = vpop.eup %2429 }
 0xa52   :  { %v917_v2 = vadd.f32 1.0, %v2430_v1 }
 0xa54   :  { %v919_v12 = vmul.f32 %v917_v2, %v903_v4 }
 0xa55   :  { %v2432_v3 = vpop.eup %2431 }
 0xa56   :  { %v918_v9 = vadd.f32 1.0, %v2432_v3 }
 0xa58   :  { %v920_v13 = vmul.f32 %v918_v9, %v904_v7 }
 0xa5a   :  { %v921_v14 = vpack.c.bf16 %v920_v13, %v919_v12 }
 0xa5c   :  { %2267 = vmatmul.mubr.msk.bf16.vlgmr.msra.gmra.mxu1 %vm937_vm8, %v921_v14 }
 0xa5d   :  { %2286 = vmatprep.mubr.msk.bf16.mxu1 %vm2493_vm4, %v2492_v6 }
 0xb1c   :  { %v981_v8 = vpop.f32.mrf.mxu1 }
 0xb1d   :  { %v982_v11 = vadd.f32 %v2042_v15, %v981_v8 }
 0xb1e   :  { %v2268_v16 = vpop.f32.mrf.mxu1 }
 0xb1f   :  { %v988_v18 = vadd.f32 %v982_v11, %v839_v17 }
 0xb20   :  { %v984_v19 = vpop.f32.mrf.mxu1 }
 0xb21   :  { %v985_v20 = vadd.f32 %v2042_v15, %v984_v19  ;;  %v992_v21 = vsel %vm143_vm3, %v988_v18, 0.0 }
 0xb22   :  { %993 = vadd.xlane.f32.xlu0 %v992_v21  ;;  %v2269_v22 = vpop.f32.mrf.mxu1 }
 0xb23   :  { %v989_v59 = vadd.f32 %v985_v20, %v840_v40 }
 0xb25   :  { %v995_v23 = vsel %vm143_vm3, %v989_v59, 0.0 }
 0xb26   :  { %996 = vadd.xlane.f32.xlu1 %v995_v23 }
 0xbab   :  { %v994_v5 = vpop.xlane.xlu0 %993 }
 0xbac   :  { %v998_v60 = vmul.f32 0.03125, %v994_v5 }
 0xbae   :  { %v1000_v10 = vsub.f32 %v988_v18, %v998_v60 }
 0xbaf   :  { %v997_v24 = vpop.xlane.xlu1 %996 }
 0xbb0   :  { %v999_v25 = vmul.f32 0.03125, %v997_v24  ;;  %v1002_v26 = vmul.f32 %v1000_v10, %v1000_v10 }
 0xbb2   :  { %v1001_v27 = vsub.f32 %v989_v59, %v999_v25  ;;  %v1004_v28 = vsel %vm143_vm3, %v1002_v26, 0.0 }
 0xbb3   :  { %1005 = vadd.xlane.f32.xlu0 %v1004_v28 }
 0xbb4   :  { %v1003_v29 = vmul.f32 %v1001_v27, %v1001_v27 }
 0xbb6   :  { %v1007_v30 = vsel %vm143_vm3, %v1003_v29, 0.0 }
 0xbb7   :  { %1008 = vadd.xlane.f32.xlu1 %v1007_v30 }
 0xc3c   :  { %v1006_v34 = vpop.xlane.xlu0 %1005 }
 0xc3d   :  { %v1010_v36 = vmul.f32 0.03125, %v1006_v34 }
 0xc3f   :  { %v1012_v37 = vadd.f32 1e-12, %v1010_v36 }
 0xc40   :  { %v1009_v38 = vpop.xlane.xlu1 %1008 }
 0xc41   :  { %2433 = vrsqrt.f32 %v1012_v37  ;;  %v1011_v39 = vmul.f32 0.03125, %v1009_v38 }
 0xc43   :  { %v1013_v17 = vadd.f32 1e-12, %v1011_v39 }
 0xc45   :  { %2435 = vrsqrt.f32 %v1013_v17 }
 0xc4e   :  { %v2434_v40 = vpop.eup %2433 }
 0xc4f   :  { %v1016_v41 = vmul.f32 %v2434_v40, %v1000_v10 }
 0xc51   :  { %v1022_v45 = vmul.f32 %v2046_v42, %v1016_v41 }
 0xc52   :  { %v2436_v43 = vpop.eup %2435 }
 0xc53   :  { %v1017_v44 = vmul.f32 %v2436_v43, %v1001_v27  ;;  %v2786_v48 = vadd.f32 %v2047_v46, %v1022_v45 }
 0xc55   :  { %v1023_v47 = vmul.f32 %v2046_v42, %v1017_v44 }
 0xc57   :  { %v2788_v49 = vadd.f32 %v2047_v46, %v1023_v47 }
 0xc59   :  { %v1046_v50 = vpack.c.bf16 %v2788_v49, %v2786_v48 }
 0xc5b   :  { %2275 = vmatmul.mubr.msk.bf16.vlgmr.msra.gmra.mxu0 %vm143_vm3, %v1046_v50 }
 0xc5c   :  { %2280 = vmatprep.mubr.msk.bf16.mxu0 %vm2493_vm4, %v2492_v6 }
 0xd1b   :  { %v1101_v52 = vpop.f32.mrf.mxu0 }
 0xd1c   :  { %v1102_v53 = vadd.f32 %v2048_v51, %v1101_v52 }
 0xd1d   :  { %v2276_v54 = vpop.f32.mrf.mxu0 }
 0xd1e   :  { %1109 = vrot.lane.b32.xlu0 %v1102_v53, %s2494_s9  ;;  %v2804_v63 = vpack.c.bf16 %v1102_v53, %v1102_v53 }
 0xd1f   :  { %v1104_v55 = vpop.f32.mrf.mxu0 }
 0xd20   :  { %v1105_v56 = vadd.f32 %v2048_v51, %v1104_v55 }
 0xd21   :  { %v2277_v57 = vpop.f32.mrf.mxu0 }
 0xd22   :  { %1113 = vrot.lane.b32.xlu1 %v1105_v56, %s2494_s9  ;;  %v2812_v1 = vpack.c.bf16 %v1105_v56, %v1105_v56 }
 0xd90   :  { %v1110_v58 = vpop.permute.xlu0 %1109 }
 0xd91   :  { %v2800_v61 = vpack.c.bf16 %v1110_v58, %v1110_v58 }
 0xd93   :  { %1170 = vrot.lane.b32.xlu1 %v2800_v61, %s2495_s10 }
 0xd94   :  { %v1114_v62 = vpop.permute.xlu1 %1113 }
 0xd95   :  { %v2806_v0 = vpack.c.bf16 %v1114_v62, %v1114_v62 }
 0xd97   :  { %1121 = vrot.lane.b32.xlu1 %v2804_v63, %s2495_s10  ;;  %1268 = vrot.lane.b32.xlu0 %v2806_v0, %s2495_s10 }
 0xd9b   :  { %1219 = vrot.lane.b32.xlu0 %v2812_v1, %s2495_s10 }
 0xe05   :  { %v1171_v2 = vpop.permute.xlu1 %1170 }
 0xe06   :  { %v1176_v3 = vsel %vm291_vm5, %v1171_v2, 0 }
 0xe07   :  { %2285 = vmatpush3.bf16.xpose.msra.mxu1 %v1176_v3 }
 0xe08   :  { %2296 = vmatprep.subr.bf16.mxu1 %v2492_v6 }
 0xe09   :  { %v1269_v4 = vpop.permute.xlu0 %1268  ;;  %v1122_v7 = vpop.permute.xlu1 %1121 }
 0xe0a   :  { %v1127_v9 = vsel %vm291_vm5, %v1122_v7, 0  ;;  %v1274_v12 = vsel %vm291_vm5, %v1269_v4, 0 }
 0xe0b   :  { %2279 = vmatpush3.bf16.xpose.msra.mxu0 %v1127_v9 }
 0xe0c   :  { %2290 = vmatprep.subr.bf16.mxu0 %v2492_v6 }
 0xe0d   :  { %v1220_v13 = vpop.permute.xlu0 %1219 }
 0xe0e   :  { %2287 = vmatmul.mubr.msk.bf16.vlgmr.msra.gmra.mxu1 %vm291_vm5, %v2800_v61  ;;  %v1225_v14 = vsel %vm291_vm5, %v1220_v13, 0 }
 0xe0f   :  { %2297 = vmatpush3.bf16.xpose.msra.mxu1 %v1274_v12  ;;  %2298 = vmatprep.mubr.msk.bf16.mxu1 %vm2493_vm4, %v2492_v6 }
 0xe10   :  { %2308 = vmatprep.subr.bf16.mxu1 %v2492_v6 }
 0xe12   :  { %2281 = vmatmul.mubr.msk.bf16.vlgmr.msra.gmra.mxu0 %vm291_vm5, %v2804_v63 }
 0xe13   :  { %2291 = vmatpush3.bf16.xpose.msra.mxu0 %v1225_v14  ;;  %2292 = vmatprep.mubr.msk.bf16.mxu0 %vm2493_vm4, %v2492_v6 }
 0xe14   :  { %2302 = vmatprep.subr.bf16.mxu0 %v2492_v6 }
 0xe16   :  { %2299 = vmatmul.mubr.msk.bf16.vlgmr.msra.gmra.mxu1 %vm291_vm5, %v2806_v0 }
 0xe17   :  { %2310 = vmatprep.mubr.msk.bf16.mxu1 %vm2493_vm4, %v2492_v6 }
 0xe1a   :  { %2293 = vmatmul.mubr.msk.bf16.vlgmr.msra.gmra.mxu0 %vm291_vm5, %v2812_v1 }
 0xe1b   :  { %2304 = vmatprep.mubr.msk.bf16.mxu0 %vm2493_vm4, %v2492_v6 }
 0xece   :  { %v1212_v15 = vpop.f32.mrf.mxu1 }
 0xecf   :  { %v1213_v8 = vadd.f32 %v1212_v15, %v2665_v32 }
 0xed0   :  { %v2288_v11 = vpop.f32.mrf.mxu1 }
 0xed1   :  { %v1319_v16 = vsel %vm485_vm6, %v1213_v8, -inf }
 0xed2   :  { %v1163_v18 = vpop.f32.mrf.mxu0  ;;  %1320 = vmax.xlane.f32.xlu1 %v1319_v16  ;;  %v1215_v19 = vpop.f32.mrf.mxu1 }
 0xed3   :  { %v1164_v10 = vadd.f32 %v1163_v18, %v2665_v32 }
 0xed4   :  { %v2282_v20 = vpop.f32.mrf.mxu0  ;;  %v2289_v21 = vpop.f32.mrf.mxu1 }
 0xed5   :  { %v1316_v31 = vsel %vm485_vm6, %v1164_v10, -inf  ;;  %v2395_v21 = vld [vmem:[%s2977_s3 + $0x64] ss:$16 sps:$4 sm:$0xff]  }
 0xed6   :  { %v1166_v22 = vpop.f32.mrf.mxu0  ;;  %v1310_v59 = vpop.f32.mrf.mxu1 }
 0xed7   :  { %v1311_v23 = vadd.f32 %v1310_v59, %v2668_v35  ;;  %v2396_v22 = vld [vmem:[%s2977_s3 + $0x44] ss:$16 sps:$4 sm:$0xff]  }
 0xed8   :  { %v2283_v5 = vpop.f32.mrf.mxu0  ;;  %v2300_v60 = vpop.f32.mrf.mxu1 }
 0xed9   :  { %v1325_v24 = vsel %vm485_vm6, %v1311_v23, -inf }
 0xeda   :  { %v1261_v25 = vpop.f32.mrf.mxu0  ;;  %1326 = vmax.xlane.f32.xlu0 %v1325_v24  ;;  %v1313_v26 = vpop.f32.mrf.mxu1 }
 0xedb   :  { %v1262_v27 = vadd.f32 %v1261_v25, %v2668_v35 }
 0xedc   :  { %v2294_v28 = vpop.f32.mrf.mxu0  ;;  %v2301_v29 = vpop.f32.mrf.mxu1 }
 0xedd   :  { %v1322_v30 = vsel %vm485_vm6, %v1262_v27, -inf }
 0xede   :  { %v1264_v33 = vpop.f32.mrf.mxu0  ;;  %1323 = vmax.xlane.f32.xlu1 %v1322_v30  ;;  %1317 = vmax.xlane.f32.xlu0 %v1316_v31 }
 0xee0   :  { %v2295_v34 = vpop.f32.mrf.mxu0 }
 0xf5b   :  { %v1321_v36 = vpop.xlane.xlu1 %1320 }
 0xf5c   :  { %v1329_v37 = vsub.f32 %v1213_v8, %v1321_v36 }
 0xf5e   :  { %v1334_v32 = vmul.f32 1.442695, %v1329_v37 }
 0xf60   :  { %2437 = vpow2.f32 %v1334_v32 }
 0xf63   :  { %v1327_v38 = vpop.xlane.xlu0 %1326 }
 0xf64   :  { %v1331_v39 = vsub.f32 %v1311_v23, %v1327_v38 }
 0xf66   :  { %v1338_v17 = vmul.f32 1.442695, %v1331_v39 }
 0xf67   :  { %v1324_v43 = vpop.xlane.xlu1 %1323  ;;  %v1318_v46 = vpop.xlane.xlu0 %1317 }
 0xf68   :  { %2439 = vpow2.f32 %v1338_v17  ;;  %v1330_v44 = vsub.f32 %v1262_v27, %v1324_v43  ;;  %v1328_v47 = vsub.f32 %v1164_v10, %v1318_v46 }
 0xf6a   :  { %v1336_v45 = vmul.f32 1.442695, %v1330_v44  ;;  %v1332_v50 = vmul.f32 1.442695, %v1328_v47 }
 0xf6c   :  { %2441 = vpow2.f32 %v1336_v45 }
 0xf6d   :  { %v2438_v40 = vpop.eup %2437  ;;  %2443 = vpow2.f32 %v1332_v50 }
 0xf6e   :  { %v1343_v35 = vsel %vm485_vm6, %v2438_v40, 0.0 }
 0xf6f   :  { %1344 = vadd.xlane.f32.xlu0 %v1343_v35 }
 0xf75   :  { %v2440_v41 = vpop.eup %2439 }
 0xf76   :  { %v1349_v42 = vsel %vm485_vm6, %v2440_v41, 0.0 }
 0xf77   :  { %1350 = vadd.xlane.f32.xlu1 %v1349_v42 }
 0xf79   :  { %v2442_v51 = vpop.eup %2441 }
 0xf7a   :  { %v1346_v52 = vsel %vm485_vm6, %v2442_v51, 0.0  ;;  %v2444_v53 = vpop.eup %2443 }
 0xf7b   :  { %v1340_v54 = vsel %vm485_vm6, %v2444_v53, 0.0 }
 0xf85   :  { %1412 = vrot.lane.b32.xlu0 %v2800_v61, %s2496_s1 }
 0xf88   :  { %1508 = vrot.lane.b32.xlu1 %v2806_v0, %s2496_s1 }
 0xfa4   :  { %1347 = vadd.xlane.f32.xlu0 %v1346_v52 }
 0xfac   :  { %1341 = vadd.xlane.f32.xlu1 %v1340_v54 }
 0xfba   :  { %1364 = vrot.lane.b32.xlu0 %v2804_v63, %s2496_s1 }
 0xfbd   :  { %1460 = vrot.lane.b32.xlu1 %v2812_v1, %s2496_s1 }
 0xff8   :  { %v1345_v55 = vpop.xlane.xlu0 %1344 }
 0xff9   :  { %2445 = vrcp.f32 %v1345_v55 }
 0xffc   :  { %v1413_v56 = vpop.permute.xlu0 %1412 }
 0xffd   :  { %v1418_v57 = vsel %vm539_vm7, %v1413_v56, 0 }
 0xffe   :  { %2309 = vmatpush3.bf16.msra.mxu1 %v1418_v57 }
 0xfff   :  { %2320 = vmatprep.subr.bf16.mxu1 %v2492_v6 }
0x1000   :  { %v1351_v58 = vpop.xlane.xlu1 %1350 }
0x1001   :  { %2447 = vrcp.f32 %v1351_v58 }
0x1004   :  { %v1509_v0 = vpop.permute.xlu1 %1508 }
0x1005   :  { %v1514_v3 = vsel %vm539_vm7, %v1509_v0, 0 }
0x1006   :  { %v2446_v61 = vpop.eup %2445 }
0x1007   :  { %v1357_v62 = vmul.f32 %v2446_v61, %v2438_v40 }
0x1009   :  { %v1361_v2 = vpack.c.bf16 %v1357_v62, %v1357_v62 }
0x100b   :  { %2311 = vmatmul.mubr.msk.bf16.vlgmr.msra.gmra.mxu1 %vm485_vm6, %v1361_v2 }
0x100c   :  { %2321 = vmatpush3.bf16.msra.mxu1 %v1514_v3  ;;  %2322 = vmatprep.mubr.msk.bf16.mxu1 %vm2493_vm4, %v2492_v6  ;;  %v2398_v3 = vld [vmem:[%s2977_s3 + $0x48] ss:$16 sps:$4 sm:$0xff]  }
0x100d   :  { %2334 = vmatprep.subr.bf16.mxu1 %v2492_v6 }
0x100e   :  { %v2448_v63 = vpop.eup %2447 }
0x100f   :  { %v1359_v1 = vmul.f32 %v2448_v63, %v2440_v41  ;;  %v2060_v41 = vld [vmem:[%s2978_s4 + $0x9] ss:$0 sm:$0xff] }
0x1011   :  { %v1363_v4 = vpack.c.bf16 %v1359_v1, %v1359_v1 }
0x1013   :  { %2323 = vmatmul.mubr.msk.bf16.vlgmr.msra.gmra.mxu1 %vm485_vm6, %v1363_v4 }
0x1014   :  { %2338 = vmatprep.mubr.msk.bf16.mxu1 %vm2493_vm4, %v2492_v6 }
0x102d   :  { %v1348_v7 = vpop.xlane.xlu0 %1347 }
0x1031   :  { %v1365_v9 = vpop.permute.xlu0 %1364 }
0x1032   :  { %v1370_v12 = vsel %vm539_vm7, %v1365_v9, 0 }
0x1033   :  { %2303 = vmatpush3.bf16.msra.mxu0 %v1370_v12 }
0x1034   :  { %2314 = vmatprep.subr.bf16.mxu0 %v2492_v6 }
0x1035   :  { %v1342_v13 = vpop.xlane.xlu1 %1341 }
0x1036   :  { %2449 = vrcp.f32 %v1342_v13 }
0x1037   :  { %2451 = vrcp.f32 %v1348_v7 }
0x1039   :  { %v1461_v8 = vpop.permute.xlu1 %1460 }
0x103a   :  { %v1466_v18 = vsel %vm539_vm7, %v1461_v8, 0 }
0x1043   :  { %v2450_v14 = vpop.eup %2449 }
0x1044   :  { %v1356_v15 = vmul.f32 %v2450_v14, %v2444_v53  ;;  %v2452_v16 = vpop.eup %2451 }
0x1045   :  { %v1358_v19 = vmul.f32 %v2452_v16, %v2442_v51 }
0x1046   :  { %v1360_v11 = vpack.c.bf16 %v1356_v15, %v1356_v15  ;;  %v2064_v15 = vld [vmem:[%s2978_s4 + $0xa] ss:$0 sm:$0xff] }
0x1047   :  { %v1362_v20 = vpack.c.bf16 %v1358_v19, %v1358_v19 }
0x1048   :  { %2305 = vmatmul.mubr.msk.bf16.vlgmr.msra.gmra.mxu0 %vm485_vm6, %v1360_v11 }
0x1049   :  { %2315 = vmatpush3.bf16.msra.mxu0 %v1466_v18  ;;  %2316 = vmatprep.mubr.msk.bf16.mxu0 %vm2493_vm4, %v2492_v6  ;;  %v2065_v18 = vld [vmem:[%s2978_s4 + $0xb] ss:$0 sm:$0xff] }
0x104a   :  { %2326 = vmatprep.subr.bf16.mxu0 %v2492_v6 }
0x1050   :  { %2317 = vmatmul.mubr.msk.bf16.vlgmr.msra.gmra.mxu0 %vm485_vm6, %v1362_v20 }
0x1051   :  { %2330 = vmatprep.mubr.msk.bf16.mxu0 %vm2493_vm4, %v2492_v6  ;;  %2327 = vmatpush3.bf16.msra.mxu0 %v2395_v21 }
0x1052   :  { %2328 = vmatprep.subr.bf16.mxu0 %v2492_v6 }
0x1055   :  { %2329 = vmatpush3.bf16.msra.mxu0 %v2396_v22 }
0x1056   :  { %2342 = vmatprep.subr.bf16.mxu0 %v2492_v6 }
0x10cb   :  { %v1454_v59 = vpop.f32.mrf.mxu1 }
0x10cd   :  { %v2312_v23 = vpop.f32.mrf.mxu1 }
0x10cf   :  { %v1457_v5 = vpop.f32.mrf.mxu1 }
0x10d0   :  { %v2400_v5 = vld [vmem:[%s2977_s3 + $0x4c] ss:$16 sps:$4 sm:$0xff]  }
0x10d1   :  { %v2313_v60 = vpop.f32.mrf.mxu1 }
0x10d2   :  { %v1770_v60 = vsel %vm937_vm8, %v2400_v5, 0  ;;  %v2075_v5 = vld [vmem:[%s2978_s4 + $0xf] ss:$0 sm:$0xff] }
0x10d3   :  { %v1550_v10 = vpop.f32.mrf.mxu1 }
0x10d4   :  { %v2380_v24 = vpack.i.bf16 %v1550_v10, %v1454_v59  ;;  %v2399_v59 = vld [vmem:[%s2977_s3 + $0x6c] ss:$16 sps:$4 sm:$0xff]  }
0x10d5   :  { %v2324_v25 = vpop.f32.mrf.mxu1  ;;  %v1773_v23 = vsel %vm937_vm8, %v2399_v59, 0  ;;  %v2066_v10 = vld [vmem:[%s2978_s4 + $0xc] ss:$0 sm:$0xff] }
0x10d6   :  { %2381 = vrot.lane.b32.xlu1 %v2380_v24, %s2497_s17 }
0x10d7   :  { %v1553_v26 = vpop.f32.mrf.mxu1 }
0x10d9   :  { %v2325_v27 = vpop.f32.mrf.mxu1 }
0x1108   :  { %v1406_v28 = vpop.f32.mrf.mxu0 }
0x110a   :  { %v2306_v29 = vpop.f32.mrf.mxu0 }
0x110c   :  { %v1409_v30 = vpop.f32.mrf.mxu0 }
0x110e   :  { %v2307_v31 = vpop.f32.mrf.mxu0 }
0x1110   :  { %v1502_v33 = vpop.f32.mrf.mxu0 }
0x1112   :  { %v2318_v34 = vpop.f32.mrf.mxu0 }
0x1114   :  { %v1505_v36 = vpop.f32.mrf.mxu0 }
0x1116   :  { %v2319_v37 = vpop.f32.mrf.mxu0 }
0x1148   :  { %v2382_v32 = vpop.permute.xlu1 %2381 }
0x1149   :  { %v2384_v38 = vunpack.i.h.bf16 %v2382_v32  ;;  %v2383_v39 = vunpack.i.l.bf16 %v2382_v32 }
0x114b   :  { %v1565_v17 = vsel %vm291_vm5, %v1502_v33, %v2384_v38  ;;  %v1560_v40 = vsel %vm291_vm5, %v1406_v28, %v2383_v39 }
0x114c   :  { %v1566_v35 = vpack.c.bf16 %v1565_v17, %v1560_v40 }
0x114e   :  { %2331 = vmatmul.mubr.msk.bf16.vlgmr.msra.gmra.mxu0 %vm143_vm3, %v1566_v35 }
0x114f   :  { %2346 = vmatprep.mubr.msk.bf16.mxu0 %vm2493_vm4, %v2492_v6  ;;  %2343 = vmatpush3.bf16.xpose.msra.mxu0 %v1773_v23 }
0x1150   :  { %2344 = vmatprep.subr.bf16.mxu0 %v2492_v6 }
0x1157   :  { %2345 = vmatpush3.bf16.xpose.msra.mxu0 %v1770_v60 }
0x120e   :  { %v1621_v42 = vpop.f32.mrf.mxu0 }
0x120f   :  { %v1622_v43 = vadd.f32 %v2060_v41, %v1621_v42 }
0x1210   :  { %v2332_v44 = vpop.f32.mrf.mxu0 }
0x1211   :  { %v1628_v45 = vadd.f32 %v1622_v43, %v2786_v48 }
0x1212   :  { %v1624_v46 = vpop.f32.mrf.mxu0 }
0x1213   :  { %v1625_v47 = vadd.f32 %v2060_v41, %v1624_v46  ;;  %v1632_v50 = vsel %vm143_vm3, %v1628_v45, 0.0 }
0x1214   :  { %1633 = vadd.xlane.f32.xlu0 %v1632_v50  ;;  %v2333_v51 = vpop.f32.mrf.mxu0  ;;  %v2070_v50 = vld [vmem:[%s2978_s4 + $0xd] ss:$0 sm:$0xff] }
0x1215   :  { %v1629_v52 = vadd.f32 %v1625_v47, %v2788_v49  ;;  %v2397_v49 = vld [vmem:[%s2977_s3 + $0x68] ss:$16 sps:$4 sm:$0xff]  }
0x1216   :  { %2335 = vmatpush3.bf16.msra.mxu1 %v2397_v49 }
0x1217   :  { %v1635_v53 = vsel %vm143_vm3, %v1629_v52, 0.0  ;;  %2336 = vmatprep.subr.bf16.mxu1 %v2492_v6 }
0x1218   :  { %1636 = vadd.xlane.f32.xlu1 %v1635_v53 }
0x121a   :  { %2337 = vmatpush3.bf16.msra.mxu1 %v2398_v3 }
0x121b   :  { %2350 = vmatprep.subr.bf16.mxu1 %v2492_v6 }
0x129d   :  { %v1634_v54 = vpop.xlane.xlu0 %1633 }
0x129e   :  { %v1638_v55 = vmul.f32 0.03125, %v1634_v54 }
0x12a0   :  { %v1640_v56 = vsub.f32 %v1628_v45, %v1638_v55 }
0x12a1   :  { %v1637_v57 = vpop.xlane.xlu1 %1636 }
0x12a2   :  { %v1639_v58 = vmul.f32 0.03125, %v1637_v57  ;;  %v1642_v61 = vmul.f32 %v1640_v56, %v1640_v56 }
0x12a4   :  { %v1641_v62 = vsub.f32 %v1629_v52, %v1639_v58  ;;  %v1644_v48 = vsel %vm143_vm3, %v1642_v61, 0.0 }
0x12a5   :  { %1645 = vadd.xlane.f32.xlu0 %v1644_v48 }
0x12a6   :  { %v1643_v0 = vmul.f32 %v1641_v62, %v1641_v62 }
0x12a8   :  { %v1647_v2 = vsel %vm143_vm3, %v1643_v0, 0.0 }
0x12a9   :  { %1648 = vadd.xlane.f32.xlu0 %v1647_v2 }
0x132e   :  { %v1646_v63 = vpop.xlane.xlu0 %1645 }
0x132f   :  { %v1650_v1 = vmul.f32 0.03125, %v1646_v63 }
0x1331   :  { %v1652_v4 = vadd.f32 1e-12, %v1650_v1 }
0x1332   :  { %v1649_v7 = vpop.xlane.xlu0 %1648 }
0x1333   :  { %2453 = vrsqrt.f32 %v1652_v4  ;;  %v1651_v9 = vmul.f32 0.03125, %v1649_v7 }
0x1335   :  { %v1653_v12 = vadd.f32 1e-12, %v1651_v9 }
0x1337   :  { %2455 = vrsqrt.f32 %v1653_v12  ;;  %v2401_v12 = vld [vmem:[%s2977_s3 + $0xa0] ss:$16 sps:$4 sm:$0xff]  }
0x1340   :  { %v2454_v13 = vpop.eup %2453 }
0x1341   :  { %v1656_v14 = vmul.f32 %v2454_v13, %v1640_v56  ;;  %v2402_v13 = vld [vmem:[%s2977_s3 + $0x80] ss:$16 sps:$4 sm:$0xff]  }
0x1343   :  { %v1662_v16 = vmul.f32 %v2064_v15, %v1656_v14 }
0x1344   :  { %v2456_v8 = vpop.eup %2455 }
0x1345   :  { %v1657_v11 = vmul.f32 %v2456_v8, %v1641_v62  ;;  %v1668_v20 = vadd.f32 %v2065_v18, %v1662_v16 }
0x1347   :  { %v1663_v19 = vmul.f32 %v2064_v15, %v1657_v11 }
0x1349   :  { %v1669_v21 = vadd.f32 %v2065_v18, %v1663_v19 }
0x134b   :  { %v1670_v22 = vpack.c.bf16 %v1669_v21, %v1668_v20 }
0x134d   :  { %2339 = vmatmul.mubr.msk.bf16.vlgmr.msra.gmra.mxu1 %vm143_vm3, %v1670_v22 }
0x134e   :  { %2354 = vmatprep.mubr.msk.bf16.mxu1 %vm2493_vm4, %v2492_v6  ;;  %2351 = vmatpush3.bf16.msra.mxu1 %v2401_v12 }
0x134f   :  { %2352 = vmatprep.subr.bf16.mxu1 %v2492_v6 }
0x1352   :  { %2353 = vmatpush3.bf16.msra.mxu1 %v2402_v13 }
0x1353   :  { %2358 = vmatprep.subr.bf16.mxu1 %v2492_v6 }
0x140d   :  { %v1725_v24 = vpop.f32.mrf.mxu1 }
0x140e   :  { %v1726_v25 = vadd.f32 %v2066_v10, %v1725_v24 }
0x140f   :  { %v2340_v26 = vpop.f32.mrf.mxu1 }
0x1410   :  { %v1734_v27 = vmul.f32 0.044715, %v1726_v25  ;;  %v1732_v42 = vmul.f32 0.5, %v1726_v25  ;;  %v2403_v26 = vld [vmem:[%s2977_s3 + $0xa4] ss:$16 sps:$4 sm:$0xff]  }
0x1411   :  { %v1728_v28 = vpop.f32.mrf.mxu1 }
0x1412   :  { %v1736_v29 = vmul.f32 %v1734_v27, %v1726_v25  ;;  %v1729_v30 = vadd.f32 %v2066_v10, %v1728_v28  ;;  %v2404_v27 = vld [vmem:[%s2977_s3 + $0x84] ss:$16 sps:$4 sm:$0xff]   ;;  %v2076_v28 = vld [vmem:[%s2978_s4 + $0x12] ss:$0 sm:$0xff] }
0x1413   :  { %v2341_v31 = vpop.f32.mrf.mxu1 }
0x1414   :  { %v1738_v33 = vmul.f32 %v1736_v29, %v1726_v25  ;;  %v1735_v34 = vmul.f32 0.044715, %v1729_v30  ;;  %v1733_v43 = vmul.f32 0.5, %v1729_v30 }
0x1416   :  { %v1740_v36 = vadd.f32 %v1738_v33, %v1726_v25  ;;  %v1737_v37 = vmul.f32 %v1735_v34, %v1729_v30 }
0x1418   :  { %v1742_v32 = vmul.f32 0.7978846, %v1740_v36  ;;  %v1739_v38 = vmul.f32 %v1737_v37, %v1729_v30 }
0x141a   :  { %2457 = vtanh.f32 %v1742_v32  ;;  %v1741_v39 = vadd.f32 %v1739_v38, %v1729_v30 }
0x141c   :  { %v1743_v17 = vmul.f32 0.7978846, %v1741_v39 }
0x141e   :  { %2459 = vtanh.f32 %v1743_v17  ;;  %v2080_v17 = vld [vmem:[%s2978_s4 + $0x13] ss:$0 sm:$0xff] }
0x1427   :  { %v2458_v40 = vpop.eup %2457 }
0x1428   :  { %v1746_v35 = vadd.f32 1.0, %v2458_v40 }
0x142a   :  { %v1748_v45 = vmul.f32 %v1746_v35, %v1732_v42 }
0x142b   :  { %v2460_v41 = vpop.eup %2459 }
0x142c   :  { %v1747_v44 = vadd.f32 1.0, %v2460_v41 }
0x142e   :  { %v1749_v46 = vmul.f32 %v1747_v44, %v1733_v43 }
0x1430   :  { %v1750_v47 = vpack.c.bf16 %v1749_v46, %v1748_v45 }
0x1432   :  { %2347 = vmatmul.mubr.msk.bf16.vlgmr.msra.gmra.mxu0 %vm937_vm8, %v1750_v47 }
0x14f2   :  { %v1809_v51 = vpop.f32.mrf.mxu0 }
0x14f3   :  { %v1810_v52 = vadd.f32 %v2070_v50, %v1809_v51 }
0x14f4   :  { %v2348_v53 = vpop.f32.mrf.mxu0 }
0x14f5   :  { %v1816_v54 = vadd.f32 %v1810_v52, %v1668_v20 }
0x14f6   :  { %v1812_v55 = vpop.f32.mrf.mxu0 }
0x14f7   :  { %v1813_v56 = vadd.f32 %v2070_v50, %v1812_v55  ;;  %v1820_v57 = vsel %vm143_vm3, %v1816_v54, 0.0 }
0x14f8   :  { %1821 = vadd.xlane.f32.xlu1 %v1820_v57  ;;  %v2349_v58 = vpop.f32.mrf.mxu0 }
0x14f9   :  { %v1817_v61 = vadd.f32 %v1813_v56, %v1669_v21  ;;  %v2074_v21 = vld [vmem:[%s2978_s4 + $0xe] ss:$0 sm:$0xff] }
0x14fb   :  { %v1823_v62 = vsel %vm143_vm3, %v1817_v61, 0.0 }
0x14fc   :  { %1824 = vadd.xlane.f32.xlu0 %v1823_v62 }
0x1581   :  { %v1822_v48 = vpop.xlane.xlu1 %1821 }
0x1582   :  { %v1826_v0 = vmul.f32 0.03125, %v1822_v48 }
0x1584   :  { %v1828_v2 = vsub.f32 %v1816_v54, %v1826_v0 }
0x1585   :  { %v1825_v49 = vpop.xlane.xlu0 %1824 }
0x1586   :  { %v1827_v3 = vmul.f32 0.03125, %v1825_v49  ;;  %v1830_v63 = vmul.f32 %v1828_v2, %v1828_v2 }
0x1588   :  { %v1829_v1 = vsub.f32 %v1817_v61, %v1827_v3  ;;  %v1832_v4 = vsel %vm143_vm3, %v1830_v63, 0.0 }
0x1589   :  { %1833 = vadd.xlane.f32.xlu1 %v1832_v4 }
0x158a   :  { %v1831_v7 = vmul.f32 %v1829_v1, %v1829_v1 }
0x158c   :  { %v1835_v9 = vsel %vm143_vm3, %v1831_v7, 0.0 }
0x158d   :  { %1836 = vadd.xlane.f32.xlu0 %v1835_v9 }
0x1612   :  { %v1834_v14 = vpop.xlane.xlu1 %1833 }
0x1613   :  { %v1838_v15 = vmul.f32 0.03125, %v1834_v14 }
0x1615   :  { %v1840_v8 = vadd.f32 1e-12, %v1838_v15 }
0x1616   :  { %v1837_v11 = vpop.xlane.xlu0 %1836 }
0x1617   :  { %2461 = vrsqrt.f32 %v1840_v8  ;;  %v1839_v16 = vmul.f32 0.03125, %v1837_v11 }
0x1619   :  { %v1841_v18 = vadd.f32 1e-12, %v1839_v16 }
0x161b   :  { %2463 = vrsqrt.f32 %v1841_v18 }
0x1624   :  { %v2462_v19 = vpop.eup %2461 }
0x1625   :  { %v1844_v20 = vmul.f32 %v2462_v19, %v1828_v2 }
0x1627   :  { %v1850_v23 = vmul.f32 %v2074_v21, %v1844_v20 }
0x1628   :  { %v2464_v22 = vpop.eup %2463 }
0x1629   :  { %v1845_v59 = vmul.f32 %v2464_v22, %v1829_v1  ;;  %v1856_v10 = vadd.f32 %v2075_v5, %v1850_v23 }
0x162b   :  { %v1851_v60 = vmul.f32 %v2074_v21, %v1845_v59 }
0x162d   :  { %v1857_v24 = vadd.f32 %v2075_v5, %v1851_v60 }
0x162f   :  { %v1866_v25 = vpack.c.bf16 %v1857_v24, %v1856_v10 }
0x1631   :  { %2355 = vmatmul.mubr.msk.bf16.vlgmr.msra.gmra.mxu1 %vm143_vm3, %v1866_v25 }
0x1632   :  { %2362 = vmatprep.mubr.msk.bf16.mxu1 %vm2493_vm4, %v2492_v6  ;;  %2359 = vmatpush3.bf16.msra.mxu1 %v2403_v26 }
0x1633   :  { %2360 = vmatprep.subr.bf16.mxu1 %v2492_v6 }
0x1636   :  { %2361 = vmatpush3.bf16.msra.mxu1 %v2404_v27 }
0x16f1   :  { %v1921_v29 = vpop.f32.mrf.mxu1 }
0x16f2   :  { %v1922_v30 = vadd.f32 %v2076_v28, %v1921_v29 }
0x16f3   :  { %v2356_v31 = vpop.f32.mrf.mxu1 }
0x16f4   :  { %2465 = vtanh.f32 %v1922_v30 }
0x16f5   :  { %v1924_v33 = vpop.f32.mrf.mxu1 }
0x16f6   :  { %v1925_v34 = vadd.f32 %v2076_v28, %v1924_v33 }
0x16f7   :  { %v2357_v36 = vpop.f32.mrf.mxu1 }
0x16f8   :  { %2467 = vtanh.f32 %v1925_v34 }
0x1701   :  { %v2466_v37 = vpop.eup %2465 }
0x1705   :  { %v2468_v32 = vpop.eup %2467 }
0x1706   :  { %v1930_v38 = vpack.c.bf16 %v2468_v32, %v2466_v37 }
0x1708   :  { %2363 = vmatmul.mubr.msk.bf16.vlgmr.msra.gmra.mxu1 %vm143_vm3, %v1930_v38 }
0x17c8   :  { %v1985_v39 = vpop.f32.mrf.mxu1 }
0x17c9   :  { %v1986_v42 = vadd.f32 %v2080_v17, %v1985_v39 }
0x17ca   :  { %v2364_v6 = vpop.f32.mrf.mxu1 }
0x17cc   :  { %v1988_v40 = vpop.f32.mrf.mxu1 }
0x17cd   :  { %v1989_v35 = vadd.f32 %v2080_v17, %v1988_v40 }
0x17ce   :  { %v2365_v41 = vpop.f32.mrf.mxu1 }
0x17cf   :  { %v1993_v43 = vrot.slane %v1989_v35, 7 }
0x17d1   :  { %v1996_v44 = vsel %vm1995_vm9, %v1986_v42, %v1993_v43 }
0x17d2   :  { %1998 = vst.msk [vmem:[#allocation2] sm:$0x3] %vm1997_vm10, %v1996_v44 }
0x17d3   :  { %2480 = shalt.err (!%p2477_p4)
}
0x17d4   :  { %2008 = dma.vmem_to_hbm [thread:$0]  %s2006_s27, 32, %s2979_s5, [#allocation3]  }
0x17d5   :  { %2489 = dma.done.wait [#allocation3], 32  }
0x17d6   :  { %2490 = vsyncadd [#allocation3], 4294967264 }
0x17d7   :  { %2012 = vsyncpa [#allocation3], 1 }

</bundles_post_ra>
